<compile_context>
chip_gen: v6e
topology: v6e:2x2x1
jax: 0.10.0
libtpu: 0.0.40
codegen_flags: <defaults>
</compile_context>

<pallas_src>
import functools

import numpy as np
import jax
import jax.numpy as jnp
from jax import lax
from jax.experimental import pallas as pl
from jax.experimental.pallas import tpu as pltpu

ACT_DTYPE = jnp.bfloat16          # storage dtype for streamed activations / GEMM weights
_VMEM_LIMIT = 32 * 1024 * 1024    # explicit scoped-VMEM budget, safe on v5e/v6e/v7x


def _is_single_tc():
    try:
        kind = jax.devices()[0].device_kind.lower()
    except Exception:
        return False
    return any(s in kind for s in ("v5 lite", "v5e", "v5lite", "v6 lite", "v6e", "v6lite"))


_SINGLE_TC = _is_single_tc()
_STREAM_CAP = 8192 if _SINGLE_TC else 4096   # lane-tile cap for streaming kernels
_MLP_CAP = 512                               # smaller cap: bounds the (128, tn) f32 MLP intermediate


def _round_up(x, m):
    return (x + m - 1) // m * m


def _cpad():
    return 16 if ACT_DTYPE == jnp.bfloat16 else 8


def _lane_tile(n, cap, want_two_steps):
    """Largest multiple-of-128 tile dividing n (<= cap); on multi-TC chips prefer >= 2 steps."""
    cap = max(128, (min(cap, n) // 128) * 128)
    best = None
    for t in range(cap, 127, -128):
        if n % t == 0:
            if best is None:
                best = t
            if (not want_two_steps) or n // t >= 2:
                return t
    # TODO(synk): pad n to a multiple of 128 for production shapes instead of a full block.
    return best if best is not None else n


def _cparams(*sem):
    return pltpu.CompilerParams(dimension_semantics=sem, vmem_limit_bytes=_VMEM_LIMIT)


# ----------------------------------------------------------------------------
# Pallas kernels (activations: (C, N) with N = B*H*W on the lane axis)
# ----------------------------------------------------------------------------
def _act(y, act):
    if act == "tanh":
        return jnp.tanh(y)
    if act == "relu":
        return jnp.maximum(y, 0.0)
    return y


def _linear_kernel(x_ref, w_ref, b_ref, o_ref, *, act):
    # o = act(w @ x + b); bf16 operands, f32 accumulation + epilogue.
    y = jnp.dot(w_ref[...], x_ref[...], preferred_element_type=jnp.float32)
    o_ref[...] = _act(y + b_ref[...], act).astype(o_ref.dtype)


def _project_kernel(x_ref, p_ref, xm_ref):
    # Truncated forward rDFT (ortho): Xm[b] += x_tile @ P_tile, resident f32 accumulator.
    @pl.when(pl.program_id(1) == 0)
    def _():
        xm_ref[...] = jnp.zeros_like(xm_ref)

    xm_ref[...] += jnp.dot(x_ref[...].astype(jnp.float32), p_ref[...],
                           preferred_element_type=jnp.float32)


def _block0_kernel(z_ref, e_ref, sc_ref, sh_ref, o_ref):
    # Fused inverse-DFT expansion of conv0's modes + BatchNorm (scale/shift) + tanh.
    y = jnp.dot(z_ref[...], e_ref[...], preferred_element_type=jnp.float32)
    o_ref[...] = jnp.tanh(y * sc_ref[...] + sh_ref[...]).astype(o_ref.dtype)


def _resblock_kernel(x_ref, w_ref, b_ref, z_ref, e_ref, o_ref, *, act):
    # Fused residual block: act( W_i @ x + b_i + inverse-DFT(conv_i modes) ).
    y = jnp.dot(w_ref[...], x_ref[...], preferred_element_type=jnp.float32)
    y = y + jnp.dot(z_ref[...], e_ref[...], preferred_element_type=jnp.float32)
    o_ref[...] = _act(y + b_ref[...], act).astype(o_ref.dtype)


def _mlp_kernel(x_ref, w1_ref, b1_ref, w2_ref, b2_ref, o_ref):
    # Fused fc1+relu+fc2+relu: the (128, tn) intermediate never touches HBM.
    h = jnp.dot(w1_ref[...], x_ref[...], preferred_element_type=jnp.float32)
    h = jnp.maximum(h + b1_ref[...], 0.0).astype(w2_ref.dtype)
    y = jnp.dot(w2_ref[...], h, preferred_element_type=jnp.float32)
    o_ref[...] = jnp.maximum(y + b2_ref[...], 0.0)


# ----------------------------------------------------------------------------
# Pallas wrappers
# ----------------------------------------------------------------------------
def linear_act(x, w, b, act):
    """act(w @ x + b).  x:(Cin,N) bf16, w:(Cout,Cin) bf16, b:(Cout,) f32 -> (Cout,N) bf16."""
    Cin, N = x.shape
    Cout = w.shape[0]
    tn = _lane_tile(N, _STREAM_CAP, not _SINGLE_TC)
    flops = 2 * Cout * Cin * N
    bytes_acc = int(x.size * np.dtype(ACT_DTYPE).itemsize + w.size * np.dtype(ACT_DTYPE).itemsize
                    + Cout * N * np.dtype(ACT_DTYPE).itemsize)
    return pl.pallas_call(
        functools.partial(_linear_kernel, act=act),
        out_shape=jax.ShapeDtypeStruct((Cout, N), ACT_DTYPE),
        grid=(pl.cdiv(N, tn),),
        in_specs=[pl.BlockSpec((Cin, tn), lambda i: (0, i)),
                  pl.BlockSpec((Cout, Cin), lambda i: (0, 0)),
                  pl.BlockSpec((Cout, 1), lambda i: (0, 0))],
        out_specs=pl.BlockSpec((Cout, tn), lambda i: (0, i)),
        compiler_params=_cparams("parallel"),
        cost_estimate=pl.CostEstimate(flops=flops, transcendentals=Cout * N,
                                      bytes_accessed=bytes_acc),
    )(x, w, b.reshape(Cout, 1))


def project_modes(x, P, B, HW):
    """Truncated forward rDFT: Xm[b*C:(b+1)*C, :] = x[:, b*HW:(b+1)*HW] @ P.  Output f32."""
    C, N = x.shape
    twoK = P.shape[1]
    thw = _lane_tile(HW, _STREAM_CAP, (not _SINGLE_TC) and B < 2)
    assert HW % thw == 0
    n_t = HW // thw
    return pl.pallas_call(
        _project_kernel,
        out_shape=jax.ShapeDtypeStruct((B * C, twoK), jnp.float32),
        grid=(B, n_t),
        in_specs=[pl.BlockSpec((C, thw), lambda b, t: (0, b * n_t + t)),
                  pl.BlockSpec((thw, twoK), lambda b, t: (t, 0))],
        out_specs=pl.BlockSpec((C, twoK), lambda b, t: (b, 0)),
        compiler_params=_cparams("parallel", "arbitrary"),
    )(x, P)


def spectral_bn_tanh(Zcat2, E, scale, shift, B, HW):
    """Block 0: tanh(scale * irDFT(conv0 modes) + shift); conv0 output never materializes."""
    BC, twoKo = Zcat2.shape
    C = BC // B
    N = B * HW
    thw = _lane_tile(HW, _STREAM_CAP, (not _SINGLE_TC) and B < 2)
    assert HW % thw == 0
    n_t = HW // thw
    return pl.pallas_call(
        _block0_kernel,
        out_shape=jax.ShapeDtypeStruct((C, N), ACT_DTYPE),
        grid=(B, n_t),
        in_specs=[pl.BlockSpec((C, twoKo), lambda b, t: (b, 0)),
                  pl.BlockSpec((twoKo, thw), lambda b, t: (0, t)),
                  pl.BlockSpec((C, 1), lambda b, t: (0, 0)),
                  pl.BlockSpec((C, 1), lambda b, t: (0, 0))],
        out_specs=pl.BlockSpec((C, thw), lambda b, t: (0, b * n_t + t)),
        compiler_params=_cparams("parallel", "parallel"),
    )(Zcat2, E, scale, shift)


def spectral_residual_act(x, w, b, Zcat2, E, B, HW, act):
    """Blocks 1-3 fused: act( w @ x + b + irDFT(conv_i modes) )."""
    C, N = x.shape
    twoKo = E.shape[0]
    thw = _lane_tile(HW, _STREAM_CAP, (not _SINGLE_TC) and B < 2)
    assert HW % thw == 0
    n_t = HW // thw
    flops = 2 * N * (C * C + C * twoKo)
    bytes_acc = int(2 * x.size * np.dtype(ACT_DTYPE).itemsize
                    + w.size * np.dtype(ACT_DTYPE).itemsize + (E.size + Zcat2.size) * 4)
    return pl.pallas_call(
        functools.partial(_resblock_kernel, act=act),
        out_shape=jax.ShapeDtypeStruct((C, N), ACT_DTYPE),
        grid=(B, n_t),
        in_specs=[pl.BlockSpec((C, thw), lambda b, t: (0, b * n_t + t)),
                  pl.BlockSpec((C, C), lambda b, t: (0, 0)),
                  pl.BlockSpec((C, 1), lambda b, t: (0, 0)),
                  pl.BlockSpec((C, twoKo), lambda b, t: (b, 0)),
                  pl.BlockSpec((twoKo, thw), lambda b, t: (0, t))],
        out_specs=pl.BlockSpec((C, thw), lambda b, t: (0, b * n_t + t)),
        compiler_params=_cparams("parallel", "parallel"),
        cost_estimate=pl.CostEstimate(flops=flops, transcendentals=C * N,
                                      bytes_accessed=bytes_acc),
    )(x, w, b.reshape(C, 1), Zcat2, E)


def fused_mlp(x, w1, b1, w2, b2):
    """relu(w2 @ relu(w1 @ x + b1) + b2) in one kernel.  Output (out_ch, N) f32, lane-dense."""
    Cin, N = x.shape
    Ch, Cout = w1.shape[0], w2.shape[0]
    tn = _lane_tile(N, _MLP_CAP, not _SINGLE_TC)
    flops = 2 * N * (Ch * Cin + Cout * Ch)
    bytes_acc = int(x.size * np.dtype(ACT_DTYPE).itemsize
                    + (w1.size + w2.size) * np.dtype(ACT_DTYPE).itemsize + Cout * N * 4)
    return pl.pallas_call(
        _mlp_kernel,
        out_shape=jax.ShapeDtypeStruct((Cout, N), jnp.float32),
        grid=(pl.cdiv(N, tn),),
        in_specs=[pl.BlockSpec((Cin, tn), lambda i: (0, i)),
                  pl.BlockSpec((Ch, Cin), lambda i: (0, 0)),
                  pl.BlockSpec((Ch, 1), lambda i: (0, 0)),
                  pl.BlockSpec((Cout, Ch), lambda i: (0, 0)),
                  pl.BlockSpec((Cout, 1), lambda i: (0, 0))],
        out_specs=pl.BlockSpec((Cout, tn), lambda i: (0, i)),
        compiler_params=_cparams("parallel"),
        cost_estimate=pl.CostEstimate(flops=flops, transcendentals=0, bytes_accessed=bytes_acc),
    )(x, w1, b1.reshape(Ch, 1), w2, b2.reshape(Cout, 1))


# ----------------------------------------------------------------------------
# Truncated-DFT bases (trace-time numpy constants), mode mixing, analytic BN
# ----------------------------------------------------------------------------
def _dft_matrices(H, W, m1, m2):
    """P:(HW, 2K) forward ortho-rDFT onto kept modes; E:(2Kout, HW) exact irfft2-ortho expansion."""
    Wf = W // 2 + 1
    assert 2 * m1 <= H and m2 <= Wf and Wf - m2 >= m2, "mode corners must not overlap"
    rows = np.concatenate([np.arange(m1), np.arange(H - m1, H)])          # kept kh
    cols_in = np.arange(m2)                                               # kept kw (input)
    cols_out = np.concatenate([np.arange(m2), np.arange(Wf - m2, Wf)])    # written kw (output)
    h_idx = np.repeat(np.arange(H), W).astype(np.float64)                 # flat index = h*W + w
    w_idx = np.tile(np.arange(W), H).astype(np.float64)
    s = np.sqrt(H * W)

    # forward: X[k] = sum_hw x[hw] * exp(-i*theta) / sqrt(HW)
    kh = np.repeat(rows, m2).astype(np.float64)
    kw = np.tile(cols_in, 2 * m1).astype(np.float64)
    th = 2 * np.pi * (np.outer(kh, h_idx) / H + np.outer(kw, w_idx) / W)
    P = np.concatenate([np.cos(th), -np.sin(th)], axis=0) / s             # (2K, HW)

    # inverse, matching torch.fft.irfft2(out_ft, s=(H,W), norm='ortho') on the sparse out_ft:
    # y[hw] = Re{ sum_k c(kw) * Z[k] * exp(+i*theta) } / sqrt(HW),  c = 1 for DC/Nyquist col, else 2.
    kh_o = np.repeat(rows, 2 * m2).astype(np.float64)
    kw_o = np.tile(cols_out, 2 * m1).astype(np.float64)
    cw = np.where(np.logical_or(kw_o == 0, np.logical_and(W % 2 == 0, kw_o == W // 2)), 1.0, 2.0)
    th_o = 2 * np.pi * (np.outer(kh_o, h_idx) / H + np.outer(kw_o, w_idx) / W)
    E = np.concatenate([cw[:, None] * np.cos(th_o), -cw[:, None] * np.sin(th_o)], axis=0) / s
    return jnp.asarray(P.T, jnp.float32), jnp.asarray(E, jnp.float32)


def _mix_modes(Xm, conv_w, m1, m2):
    """compl_mul3d on the kept modes.  Xm:(B,C,2K) f32 -> Zcat:(B,C,2Kout) f32.
    Faithful to the reference: weights3/weights4 multiply the FIRST m2 columns of x_ft
    but the result is written into the LAST m2 columns of out_ft."""
    B, C, twoK = Xm.shape
    K = twoK // 2
    Xc = (Xm[..., :K] + 1j * Xm[..., K:]).reshape(B, C, 2 * m1, m2)
    w1, w2, w3, w4 = conv_w

    def mul(a, w):                                    # == compl_mul3d (channel contraction)
        return jnp.einsum('bixy,ioxy->boxy', a, w)

    xt, xb = Xc[:, :, :m1], Xc[:, :, m1:]
    zt = jnp.concatenate([mul(xt, w1), mul(xt, w3)], axis=-1)   # [first cols | last cols]
    zb = jnp.concatenate([mul(xb, w2), mul(xb, w4)], axis=-1)
    Z = jnp.concatenate([zt, zb], axis=2).reshape(B, C, -1)     # (B,C,Kout) complex
    return jnp.concatenate([Z.real, Z.imag], axis=-1).astype(jnp.float32)


def _bn_scale_shift(Zc, E, gamma, beta, n_total, eps=1e-5):
    """Exact train-mode BN batch statistics of the (never-materialized) conv0 output,
    computed analytically from the spectral modes: sum = Zc . (E*1), sumsq = Zc G Zc^T."""
    e1 = jnp.sum(E, axis=1)                                  # (2Kout,)
    G = E @ E.T                                              # (2Kout, 2Kout)
    s1 = jnp.einsum('bck,k->c', Zc, e1)
    s2 = jnp.einsum('bck,kl,bcl->c', Zc, G, Zc)
    mean = s1 / n_total
    var = jnp.maximum(s2 / n_total - mean * mean, 0.0)       # cancellation guard
    scale = gamma * lax.rsqrt(var + eps)
    shift = beta - mean * scale
    return scale.reshape(-1, 1).astype(jnp.float32), shift.reshape(-1, 1).astype(jnp.float32)


# ----------------------------------------------------------------------------
# Parameters
# ----------------------------------------------------------------------------
def init_params(key, m1, m2, in_ch, out_ch, width):
    keys = iter(jax.random.split(key, 32))
    nk = lambda: next(keys)

    def linear(fin, fout):
        bound = float(fin) ** -0.5
        w = jax.random.uniform(nk(), (fout, fin), jnp.float32, -bound, bound)
        b = jax.random.uniform(nk(), (fout,), jnp.float32, -bound, bound)
        return w, b

    def spectral(cin, cout):
        scale = 1.0 / (cin * cout)
        return tuple(scale * jax.random.uniform(nk(), (cin, cout, m1, m2, 2), jnp.float32)
                     for _ in range(4))

    p = {}
    p["fc0_w"], p["fc0_b"] = linear(in_ch, width)
    for i in range(4):
        p[f"conv{i}"] = spectral(width, width)
    for i in (1, 2, 3):
        p[f"w{i}_w"], p[f"w{i}_b"] = linear(width, width)
    p["bn0_g"] = jnp.ones((width,), jnp.float32)
    p["bn0_b"] = jnp.zeros((width,), jnp.float32)
    p["fc1_w"], p["fc1_b"] = linear(width, 128)
    p["fc2_w"], p["fc2_b"] = linear(128, out_ch)
    return p


def prepare_params(p, width):
    """Zero-pad channel dims to a sublane-friendly width and cast GEMM weights to bf16."""
    cp = _round_up(width, _cpad())

    def pad_vec(v, n, fill=0.0):
        return jnp.pad(v, (0, n - v.shape[0]), constant_values=fill)

    q = {}
    q["fc0_w"] = jnp.pad(p["fc0_w"], ((0, cp - width), (0, 0))).astype(ACT_DTYPE)
    q["fc0_b"] = pad_vec(p["fc0_b"], cp).astype(jnp.float32)
    for i in range(4):
        wc = []
        for w in p[f"conv{i}"]:
            c = (w[..., 0] + 1j * w[..., 1]).astype(jnp.complex64)
            c = jnp.pad(c, ((0, cp - width), (0, cp - width), (0, 0), (0, 0)))
            wc.append(c)
        q[f"conv{i}"] = tuple(wc)
    for i in (1, 2, 3):
        q[f"w{i}_w"] = jnp.pad(p[f"w{i}_w"], ((0, cp - width), (0, cp - width))).astype(ACT_DTYPE)
        q[f"w{i}_b"] = pad_vec(p[f"w{i}_b"], cp).astype(jnp.float32)
    q["bn0_g"] = pad_vec(p["bn0_g"], cp, 1.0).astype(jnp.float32)
    q["bn0_b"] = pad_vec(p["bn0_b"], cp).astype(jnp.float32)
    q["fc1_w"] = jnp.pad(p["fc1_w"], ((0, 0), (0, cp - width))).astype(ACT_DTYPE)
    q["fc1_b"] = p["fc1_b"].astype(jnp.float32)
    q["fc2_w"] = p["fc2_w"].astype(ACT_DTYPE)
    q["fc2_b"] = p["fc2_b"].astype(jnp.float32)
    return q


# ----------------------------------------------------------------------------
# Net3d forward
# ----------------------------------------------------------------------------
def net3d_forward(params, x, *, m1, m2):
    # x: (B, in_ch, H, W), like the PyTorch module.
    B, Cin, H, W = x.shape
    HW = H * W
    N = B * HW
    assert HW % 128 == 0 or B == 1, "TODO(synk): pad H*W to a multiple of 128 for odd spatial sizes"

    P, E = _dft_matrices(H, W, m1, m2)      # trace-time constants

    # single boundary transpose; everything after this is reshapes only.
    xf = jnp.transpose(x, (1, 0, 2, 3)).reshape(Cin, N).astype(ACT_DTYPE)

    # fc0 + tanh
    xf = linear_act(xf, params["fc0_w"], params["fc0_b"], act="tanh")       # (CP, N)
    CP = xf.shape[0]

    def spectral_modes(a, conv_w):
        Xm = project_modes(a, P, B, HW).reshape(B, CP, -1)                  # (B, CP, 2K)
        return _mix_modes(Xm, conv_w, m1, m2)                               # (B, CP, 2Kout)

    # block 0: x = tanh(bn0(conv0(x)))   (w0 exists in the module but is unused in forward)
    Zc0 = spectral_modes(xf, params["conv0"])
    scale, shift = _bn_scale_shift(Zc0, E, params["bn0_g"], params["bn0_b"], N)
    xf = spectral_bn_tanh(Zc0.reshape(B * CP, -1), E, scale, shift, B, HW)

    # blocks 1..3: x = act(conv_i(x) + w_i(x));  act = tanh, tanh, identity
    for i, actn in ((1, "tanh"), (2, "tanh"), (3, None)):
        Zc = spectral_modes(xf, params[f"conv{i}"])
        xf = spectral_residual_act(xf, params[f"w{i}_w"], params[f"w{i}_b"],
                                   Zc.reshape(B * CP, -1), E, B, HW, act=actn)

    # fc1 + relu + fc2 + relu, fused; output (out_ch=1, N) is lane-dense, f32.
    out = fused_mlp(xf, params["fc1_w"], params["fc1_b"], params["fc2_w"], params["fc2_b"])

    out = out.reshape(-1, B, H, W)                              # (out_ch, B, H, W)
    out = jnp.transpose(out, (1, 0, 2, 3))                      # (B, out_ch, H, W)
    return jnp.squeeze(out)                                     # Net3d.forward: x.squeeze()


# ----------------------------------------------------------------------------
# Main
# ----------------------------------------------------------------------------
if __name__ == "__main__":
    modes = 2
    width = 20
    in_ch = modes
    out_ch = 1
    B, H, W = 2, 16, 16

    key = jax.random.PRNGKey(0)
    kp, kx = jax.random.split(key)
    raw_params = init_params(kp, modes, modes, in_ch, out_ch, width)
    params = prepare_params(raw_params, width)
    x = jax.random.normal(kx, (B, in_ch, H, W), jnp.float32)

    fwd = jax.jit(functools.partial(net3d_forward, m1=modes, m2=modes))
    y = fwd(params, x)
    jax.block_until_ready(y)
    assert y.shape == (B, H, W), y.shape
    print("KERNEL_OK")
</pallas_src>

<mosaic_0001>
module attributes {stable_mosaic.version = 11 : i64} {
  func.func @_project_kernel(%arg0: i32, %arg1: i32, %arg2: memref<32x256xbf16, #tpu.memory_space<vmem>>, %arg3: memref<256x16xf32, #tpu.memory_space<vmem>>, %arg4: memref<32x16xf32, #tpu.memory_space<vmem>>) attributes {dimension_semantics = [#tpu.dimension_semantics<parallel>, #tpu.dimension_semantics<arbitrary>], iteration_bounds = array<i64: 2, 1>, scalar_prefetch = 0 : i64, scratch_operands = 0 : i64, tpu.core_type = #tpu.core_type<tc>, window_params = [{transform_indices = @transform_0, window_bounds = array<i64: 32, 256>}, {transform_indices = @transform_1, window_bounds = array<i64: 256, 16>}, {transform_indices = @transform_2, window_bounds = array<i64: 32, 16>}]} {
    %c0_i32 = arith.constant 0 : i32
    %0 = arith.cmpi eq, %arg1, %c0_i32 : i32
    %1 = arith.extui %0 : i1 to i32
    %c0_i32_0 = arith.constant 0 : i32
    %2 = arith.cmpi ne, %1, %c0_i32_0 : i32
    scf.if %2 {
      %cst_8 = arith.constant 0.000000e+00 : f32
      %10 = vector.broadcast %cst_8 : f32 to vector<32x16xf32>
      %c0_9 = arith.constant 0 : index
      %c0_10 = arith.constant 0 : index
      %11 = vector.load %arg4[%c0_9, %c0_10] : memref<32x16xf32, #tpu.memory_space<vmem>>, vector<32x16xf32>
      tpu.vector_store %arg4[%c0_9, %c0_10], %10 {strides = array<i32>} : memref<32x16xf32, #tpu.memory_space<vmem>>, vector<32x16xf32>,
    } else {
    }
    %c0 = arith.constant 0 : index
    %c0_1 = arith.constant 0 : index
    %3 = vector.load %arg4[%c0, %c0_1] : memref<32x16xf32, #tpu.memory_space<vmem>>, vector<32x16xf32>
    %c0_2 = arith.constant 0 : index
    %c0_3 = arith.constant 0 : index
    %4 = vector.load %arg2[%c0_2, %c0_3] : memref<32x256xbf16, #tpu.memory_space<vmem>>, vector<32x256xbf16>
    %5 = arith.extf %4 : vector<32x256xbf16> to vector<32x256xf32>
    %c0_4 = arith.constant 0 : index
    %c0_5 = arith.constant 0 : index
    %6 = vector.load %arg3[%c0_4, %c0_5] : memref<256x16xf32, #tpu.memory_space<vmem>>, vector<256x16xf32>
    %cst = arith.constant dense<0.000000e+00> : vector<32x16xf32>
    %7 = tpu.matmul %5, %6, %cst {dimension_numbers = #tpu.dot_dimension_numbers<[1], [0], [0], [1], [0, 0, 1, 1], [], []>} : vector<32x256xf32>, vector<256x16xf32>, vector<32x16xf32> -> vector<32x16xf32>
    %8 = arith.addf %3, %7 : vector<32x16xf32>
    %c0_6 = arith.constant 0 : index
    %c0_7 = arith.constant 0 : index
    %9 = vector.load %arg4[%c0_6, %c0_7] : memref<32x16xf32, #tpu.memory_space<vmem>>, vector<32x16xf32>
    tpu.vector_store %arg4[%c0_6, %c0_7], %8 {strides = array<i32>} : memref<32x16xf32, #tpu.memory_space<vmem>>, vector<32x16xf32>,
    return
  }
  func.func @transform_0(%arg0: i32, %arg1: i32) -> (i32, i32) {
    %c1_i32 = arith.constant 1 : i32
    %0 = arith.muli %arg0, %c1_i32 : i32
    %1 = arith.addi %0, %arg1 : i32
    %c0_i32 = arith.constant 0 : i32
    %c0_i32_0 = arith.constant 0 : i32
    return %c0_i32, %1 : i32, i32
  }
  func.func @transform_1(%arg0: i32, %arg1: i32) -> (i32, i32) {
    %c0_i32 = arith.constant 0 : i32
    %c0_i32_0 = arith.constant 0 : i32
    return %arg1, %c0_i32 : i32, i32
  }
  func.func @transform_2(%arg0: i32, %arg1: i32) -> (i32, i32) {
    %c0_i32 = arith.constant 0 : i32
    %c0_i32_0 = arith.constant 0 : i32
    return %arg0, %c0_i32 : i32, i32
  }
}

module attributes {stable_mosaic.version = 11 : i64} {
  func.func @_linear_kernel(%arg0: i32, %arg1: memref<2x256xbf16, #tpu.memory_space<vmem>>, %arg2: memref<32x2xbf16, #tpu.memory_space<vmem>>, %arg3: memref<32x1xf32, #tpu.memory_space<vmem>>, %arg4: memref<32x256xbf16, #tpu.memory_space<vmem>>) attributes {dimension_semantics = [#tpu.dimension_semantics<parallel>], iteration_bounds = array<i64: 2>, scalar_prefetch = 0 : i64, scratch_operands = 0 : i64, tpu.core_type = #tpu.core_type<tc>, window_params = [{transform_indices = @transform_0, window_bounds = array<i64: 2, 256>}, {pipeline_mode = #tpu.pipeline_mode<synchronous>, transform_indices = @transform_1, window_bounds = array<i64: 32, 2>}, {pipeline_mode = #tpu.pipeline_mode<synchronous>, transform_indices = @transform_2, window_bounds = array<i64: 32, 1>}, {transform_indices = @transform_3, window_bounds = array<i64: 32, 256>}]} {
    %c0 = arith.constant 0 : index
    %c0_0 = arith.constant 0 : index
    %0 = vector.load %arg2[%c0, %c0_0] : memref<32x2xbf16, #tpu.memory_space<vmem>>, vector<32x2xbf16>
    %c0_1 = arith.constant 0 : index
    %c0_2 = arith.constant 0 : index
    %1 = vector.load %arg1[%c0_1, %c0_2] : memref<2x256xbf16, #tpu.memory_space<vmem>>, vector<2x256xbf16>
    %cst = arith.constant dense<0.000000e+00> : vector<32x256xf32>
    %2 = tpu.matmul %0, %1, %cst {dimension_numbers = #tpu.dot_dimension_numbers<[1], [0], [0], [1], [0, 0, 1, 1], [], []>} : vector<32x2xbf16>, vector<2x256xbf16>, vector<32x256xf32> -> vector<32x256xf32>
    %c0_3 = arith.constant 0 : index
    %c0_4 = arith.constant 0 : index
    %3 = vector.load %arg3[%c0_3, %c0_4] : memref<32x1xf32, #tpu.memory_space<vmem>>, vector<32x1xf32>
    %4 = vector.broadcast %3 : vector<32x1xf32> to vector<32x256xf32>
    %5 = arith.addf %2, %4 : vector<32x256xf32>
    %6 = math.tanh %5 : vector<32x256xf32>
    %7 = arith.truncf %6 : vector<32x256xf32> to vector<32x256xbf16>
    %c0_5 = arith.constant 0 : index
    %c0_6 = arith.constant 0 : index
    %8 = vector.load %arg4[%c0_5, %c0_6] : memref<32x256xbf16, #tpu.memory_space<vmem>>, vector<32x256xbf16>
    tpu.vector_store %arg4[%c0_5, %c0_6], %7 {strides = array<i32>} : memref<32x256xbf16, #tpu.memory_space<vmem>>, vector<32x256xbf16>,
    return
  }
  func.func @transform_0(%arg0: i32) -> (i32, i32) {
    %c0_i32 = arith.constant 0 : i32
    %c0_i32_0 = arith.constant 0 : i32
    return %c0_i32, %arg0 : i32, i32
  }
  func.func @transform_1(%arg0: i32) -> (i32, i32) {
    %c0_i32 = arith.constant 0 : i32
    %c0_i32_0 = arith.constant 0 : i32
    %c0_i32_1 = arith.constant 0 : i32
    return %c0_i32, %c0_i32_0 : i32, i32
  }
  func.func @transform_2(%arg0: i32) -> (i32, i32) {
    %c0_i32 = arith.constant 0 : i32
    %c0_i32_0 = arith.constant 0 : i32
    %c0_i32_1 = arith.constant 0 : i32
    return %c0_i32, %c0_i32_0 : i32, i32
  }
  func.func @transform_3(%arg0: i32) -> (i32, i32) {
    %c0_i32 = arith.constant 0 : i32
    %c0_i32_0 = arith.constant 0 : i32
    return %c0_i32, %arg0 : i32, i32
  }
}

module attributes {stable_mosaic.version = 11 : i64} {
  func.func @_block0_kernel(%arg0: i32, %arg1: i32, %arg2: memref<32x32xf32, #tpu.memory_space<vmem>>, %arg3: memref<32x256xf32, #tpu.memory_space<vmem>>, %arg4: memref<32x1xf32, #tpu.memory_space<vmem>>, %arg5: memref<32x1xf32, #tpu.memory_space<vmem>>, %arg6: memref<32x256xbf16, #tpu.memory_space<vmem>>) attributes {dimension_semantics = [#tpu.dimension_semantics<parallel>, #tpu.dimension_semantics<parallel>], iteration_bounds = array<i64: 2, 1>, scalar_prefetch = 0 : i64, scratch_operands = 0 : i64, tpu.core_type = #tpu.core_type<tc>, window_params = [{transform_indices = @transform_0, window_bounds = array<i64: 32, 32>}, {transform_indices = @transform_1, window_bounds = array<i64: 32, 256>}, {pipeline_mode = #tpu.pipeline_mode<synchronous>, transform_indices = @transform_2, window_bounds = array<i64: 32, 1>}, {pipeline_mode = #tpu.pipeline_mode<synchronous>, transform_indices = @transform_3, window_bounds = array<i64: 32, 1>}, {transform_indices = @transform_4, window_bounds = array<i64: 32, 256>}]} {
    %c0 = arith.constant 0 : index
    %c0_0 = arith.constant 0 : index
    %0 = vector.load %arg2[%c0, %c0_0] : memref<32x32xf32, #tpu.memory_space<vmem>>, vector<32x32xf32>
    %c0_1 = arith.constant 0 : index
    %c0_2 = arith.constant 0 : index
    %1 = vector.load %arg3[%c0_1, %c0_2] : memref<32x256xf32, #tpu.memory_space<vmem>>, vector<32x256xf32>
    %cst = arith.constant dense<0.000000e+00> : vector<32x256xf32>
    %2 = tpu.matmul %0, %1, %cst {dimension_numbers = #tpu.dot_dimension_numbers<[1], [0], [0], [1], [0, 0, 1, 1], [], []>} : vector<32x32xf32>, vector<32x256xf32>, vector<32x256xf32> -> vector<32x256xf32>
    %c0_3 = arith.constant 0 : index
    %c0_4 = arith.constant 0 : index
    %3 = vector.load %arg4[%c0_3, %c0_4] : memref<32x1xf32, #tpu.memory_space<vmem>>, vector<32x1xf32>
    %4 = vector.broadcast %3 : vector<32x1xf32> to vector<32x256xf32>
    %5 = arith.mulf %2, %4 : vector<32x256xf32>
    %c0_5 = arith.constant 0 : index
    %c0_6 = arith.constant 0 : index
    %6 = vector.load %arg5[%c0_5, %c0_6] : memref<32x1xf32, #tpu.memory_space<vmem>>, vector<32x1xf32>
    %7 = vector.broadcast %6 : vector<32x1xf32> to vector<32x256xf32>
    %8 = arith.addf %5, %7 : vector<32x256xf32>
    %9 = math.tanh %8 : vector<32x256xf32>
    %10 = arith.truncf %9 : vector<32x256xf32> to vector<32x256xbf16>
    %c0_7 = arith.constant 0 : index
    %c0_8 = arith.constant 0 : index
    %11 = vector.load %arg6[%c0_7, %c0_8] : memref<32x256xbf16, #tpu.memory_space<vmem>>, vector<32x256xbf16>
    tpu.vector_store %arg6[%c0_7, %c0_8], %10 {strides = array<i32>} : memref<32x256xbf16, #tpu.memory_space<vmem>>, vector<32x256xbf16>,
    return
  }
  func.func @transform_0(%arg0: i32, %arg1: i32) -> (i32, i32) {
    %c0_i32 = arith.constant 0 : i32
    %c0_i32_0 = arith.constant 0 : i32
    return %arg0, %c0_i32 : i32, i32
  }
  func.func @transform_1(%arg0: i32, %arg1: i32) -> (i32, i32) {
    %c0_i32 = arith.constant 0 : i32
    %c0_i32_0 = arith.constant 0 : i32
    return %c0_i32, %arg1 : i32, i32
  }
  func.func @transform_2(%arg0: i32, %arg1: i32) -> (i32, i32) {
    %c0_i32 = arith.constant 0 : i32
    %c0_i32_0 = arith.constant 0 : i32
    %c0_i32_1 = arith.constant 0 : i32
    return %c0_i32, %c0_i32_0 : i32, i32
  }
  func.func @transform_3(%arg0: i32, %arg1: i32) -> (i32, i32) {
    %c0_i32 = arith.constant 0 : i32
    %c0_i32_0 = arith.constant 0 : i32
    %c0_i32_1 = arith.constant 0 : i32
    return %c0_i32, %c0_i32_0 : i32, i32
  }
  func.func @transform_4(%arg0: i32, %arg1: i32) -> (i32, i32) {
    %c1_i32 = arith.constant 1 : i32
    %0 = arith.muli %arg0, %c1_i32 : i32
    %1 = arith.addi %0, %arg1 : i32
    %c0_i32 = arith.constant 0 : i32
    %c0_i32_0 = arith.constant 0 : i32
    return %c0_i32, %1 : i32, i32
  }
}

module attributes {stable_mosaic.version = 11 : i64} {
  func.func @_resblock_kernel(%arg0: i32, %arg1: i32, %arg2: memref<32x256xbf16, #tpu.memory_space<vmem>>, %arg3: memref<32x32xbf16, #tpu.memory_space<vmem>>, %arg4: memref<32x1xf32, #tpu.memory_space<vmem>>, %arg5: memref<32x32xf32, #tpu.memory_space<vmem>>, %arg6: memref<32x256xf32, #tpu.memory_space<vmem>>, %arg7: memref<32x256xbf16, #tpu.memory_space<vmem>>) attributes {dimension_semantics = [#tpu.dimension_semantics<parallel>, #tpu.dimension_semantics<parallel>], iteration_bounds = array<i64: 2, 1>, scalar_prefetch = 0 : i64, scratch_operands = 0 : i64, tpu.core_type = #tpu.core_type<tc>, window_params = [{transform_indices = @transform_0, window_bounds = array<i64: 32, 256>}, {pipeline_mode = #tpu.pipeline_mode<synchronous>, transform_indices = @transform_1, window_bounds = array<i64: 32, 32>}, {pipeline_mode = #tpu.pipeline_mode<synchronous>, transform_indices = @transform_2, window_bounds = array<i64: 32, 1>}, {transform_indices = @transform_3, window_bounds = array<i64: 32, 32>}, {transform_indices = @transform_4, window_bounds = array<i64: 32, 256>}, {transform_indices = @transform_5, window_bounds = array<i64: 32, 256>}]} {
    %c0 = arith.constant 0 : index
    %c0_0 = arith.constant 0 : index
    %0 = vector.load %arg3[%c0, %c0_0] : memref<32x32xbf16, #tpu.memory_space<vmem>>, vector<32x32xbf16>
    %c0_1 = arith.constant 0 : index
    %c0_2 = arith.constant 0 : index
    %1 = vector.load %arg2[%c0_1, %c0_2] : memref<32x256xbf16, #tpu.memory_space<vmem>>, vector<32x256xbf16>
    %cst = arith.constant dense<0.000000e+00> : vector<32x256xf32>
    %2 = tpu.matmul %0, %1, %cst {dimension_numbers = #tpu.dot_dimension_numbers<[1], [0], [0], [1], [0, 0, 1, 1], [], []>} : vector<32x32xbf16>, vector<32x256xbf16>, vector<32x256xf32> -> vector<32x256xf32>
    %c0_3 = arith.constant 0 : index
    %c0_4 = arith.constant 0 : index
    %3 = vector.load %arg5[%c0_3, %c0_4] : memref<32x32xf32, #tpu.memory_space<vmem>>, vector<32x32xf32>
    %c0_5 = arith.constant 0 : index
    %c0_6 = arith.constant 0 : index
    %4 = vector.load %arg6[%c0_5, %c0_6] : memref<32x256xf32, #tpu.memory_space<vmem>>, vector<32x256xf32>
    %cst_7 = arith.constant dense<0.000000e+00> : vector<32x256xf32>
    %5 = tpu.matmul %3, %4, %cst_7 {dimension_numbers = #tpu.dot_dimension_numbers<[1], [0], [0], [1], [0, 0, 1, 1], [], []>} : vector<32x32xf32>, vector<32x256xf32>, vector<32x256xf32> -> vector<32x256xf32>
    %6 = arith.addf %2, %5 : vector<32x256xf32>
    %c0_8 = arith.constant 0 : index
    %c0_9 = arith.constant 0 : index
    %7 = vector.load %arg4[%c0_8, %c0_9] : memref<32x1xf32, #tpu.memory_space<vmem>>, vector<32x1xf32>
    %8 = vector.broadcast %7 : vector<32x1xf32> to vector<32x256xf32>
    %9 = arith.addf %6, %8 : vector<32x256xf32>
    %10 = arith.truncf %9 : vector<32x256xf32> to vector<32x256xbf16>
    %c0_10 = arith.constant 0 : index
    %c0_11 = arith.constant 0 : index
    %11 = vector.load %arg7[%c0_10, %c0_11] : memref<32x256xbf16, #tpu.memory_space<vmem>>, vector<32x256xbf16>
    tpu.vector_store %arg7[%c0_10, %c0_11], %10 {strides = array<i32>} : memref<32x256xbf16, #tpu.memory_space<vmem>>, vector<32x256xbf16>,
    return
  }
  func.func @transform_0(%arg0: i32, %arg1: i32) -> (i32, i32) {
    %c1_i32 = arith.constant 1 : i32
    %0 = arith.muli %arg0, %c1_i32 : i32
    %1 = arith.addi %0, %arg1 : i32
    %c0_i32 = arith.constant 0 : i32
    %c0_i32_0 = arith.constant 0 : i32
    return %c0_i32, %1 : i32, i32
  }
  func.func @transform_1(%arg0: i32, %arg1: i32) -> (i32, i32) {
    %c0_i32 = arith.constant 0 : i32
    %c0_i32_0 = arith.constant 0 : i32
    %c0_i32_1 = arith.constant 0 : i32
    return %c0_i32, %c0_i32_0 : i32, i32
  }
  func.func @transform_2(%arg0: i32, %arg1: i32) -> (i32, i32) {
    %c0_i32 = arith.constant 0 : i32
    %c0_i32_0 = arith.constant 0 : i32
    %c0_i32_1 = arith.constant 0 : i32
    return %c0_i32, %c0_i32_0 : i32, i32
  }
  func.func @transform_3(%arg0: i32, %arg1: i32) -> (i32, i32) {
    %c0_i32 = arith.constant 0 : i32
    %c0_i32_0 = arith.constant 0 : i32
    return %arg0, %c0_i32 : i32, i32
  }
  func.func @transform_4(%arg0: i32, %arg1: i32) -> (i32, i32) {
    %c0_i32 = arith.constant 0 : i32
    %c0_i32_0 = arith.constant 0 : i32
    return %c0_i32, %arg1 : i32, i32
  }
  func.func @transform_5(%arg0: i32, %arg1: i32) -> (i32, i32) {
    %c1_i32 = arith.constant 1 : i32
    %0 = arith.muli %arg0, %c1_i32 : i32
    %1 = arith.addi %0, %arg1 : i32
    %c0_i32 = arith.constant 0 : i32
    %c0_i32_0 = arith.constant 0 : i32
    return %c0_i32, %1 : i32, i32
  }
}

module attributes {stable_mosaic.version = 11 : i64} {
  func.func @_resblock_kernel(%arg0: i32, %arg1: i32, %arg2: memref<32x256xbf16, #tpu.memory_space<vmem>>, %arg3: memref<32x32xbf16, #tpu.memory_space<vmem>>, %arg4: memref<32x1xf32, #tpu.memory_space<vmem>>, %arg5: memref<32x32xf32, #tpu.memory_space<vmem>>, %arg6: memref<32x256xf32, #tpu.memory_space<vmem>>, %arg7: memref<32x256xbf16, #tpu.memory_space<vmem>>) attributes {dimension_semantics = [#tpu.dimension_semantics<parallel>, #tpu.dimension_semantics<parallel>], iteration_bounds = array<i64: 2, 1>, scalar_prefetch = 0 : i64, scratch_operands = 0 : i64, tpu.core_type = #tpu.core_type<tc>, window_params = [{transform_indices = @transform_0, window_bounds = array<i64: 32, 256>}, {pipeline_mode = #tpu.pipeline_mode<synchronous>, transform_indices = @transform_1, window_bounds = array<i64: 32, 32>}, {pipeline_mode = #tpu.pipeline_mode<synchronous>, transform_indices = @transform_2, window_bounds = array<i64: 32, 1>}, {transform_indices = @transform_3, window_bounds = array<i64: 32, 32>}, {transform_indices = @transform_4, window_bounds = array<i64: 32, 256>}, {transform_indices = @transform_5, window_bounds = array<i64: 32, 256>}]} {
    %c0 = arith.constant 0 : index
    %c0_0 = arith.constant 0 : index
    %0 = vector.load %arg3[%c0, %c0_0] : memref<32x32xbf16, #tpu.memory_space<vmem>>, vector<32x32xbf16>
    %c0_1 = arith.constant 0 : index
    %c0_2 = arith.constant 0 : index
    %1 = vector.load %arg2[%c0_1, %c0_2] : memref<32x256xbf16, #tpu.memory_space<vmem>>, vector<32x256xbf16>
    %cst = arith.constant dense<0.000000e+00> : vector<32x256xf32>
    %2 = tpu.matmul %0, %1, %cst {dimension_numbers = #tpu.dot_dimension_numbers<[1], [0], [0], [1], [0, 0, 1, 1], [], []>} : vector<32x32xbf16>, vector<32x256xbf16>, vector<32x256xf32> -> vector<32x256xf32>
    %c0_3 = arith.constant 0 : index
    %c0_4 = arith.constant 0 : index
    %3 = vector.load %arg5[%c0_3, %c0_4] : memref<32x32xf32, #tpu.memory_space<vmem>>, vector<32x32xf32>
    %c0_5 = arith.constant 0 : index
    %c0_6 = arith.constant 0 : index
    %4 = vector.load %arg6[%c0_5, %c0_6] : memref<32x256xf32, #tpu.memory_space<vmem>>, vector<32x256xf32>
    %cst_7 = arith.constant dense<0.000000e+00> : vector<32x256xf32>
    %5 = tpu.matmul %3, %4, %cst_7 {dimension_numbers = #tpu.dot_dimension_numbers<[1], [0], [0], [1], [0, 0, 1, 1], [], []>} : vector<32x32xf32>, vector<32x256xf32>, vector<32x256xf32> -> vector<32x256xf32>
    %6 = arith.addf %2, %5 : vector<32x256xf32>
    %c0_8 = arith.constant 0 : index
    %c0_9 = arith.constant 0 : index
    %7 = vector.load %arg4[%c0_8, %c0_9] : memref<32x1xf32, #tpu.memory_space<vmem>>, vector<32x1xf32>
    %8 = vector.broadcast %7 : vector<32x1xf32> to vector<32x256xf32>
    %9 = arith.addf %6, %8 : vector<32x256xf32>
    %10 = math.tanh %9 : vector<32x256xf32>
    %11 = arith.truncf %10 : vector<32x256xf32> to vector<32x256xbf16>
    %c0_10 = arith.constant 0 : index
    %c0_11 = arith.constant 0 : index
    %12 = vector.load %arg7[%c0_10, %c0_11] : memref<32x256xbf16, #tpu.memory_space<vmem>>, vector<32x256xbf16>
    tpu.vector_store %arg7[%c0_10, %c0_11], %11 {strides = array<i32>} : memref<32x256xbf16, #tpu.memory_space<vmem>>, vector<32x256xbf16>,
    return
  }
  func.func @transform_0(%arg0: i32, %arg1: i32) -> (i32, i32) {
    %c1_i32 = arith.constant 1 : i32
    %0 = arith.muli %arg0, %c1_i32 : i32
    %1 = arith.addi %0, %arg1 : i32
    %c0_i32 = arith.constant 0 : i32
    %c0_i32_0 = arith.constant 0 : i32
    return %c0_i32, %1 : i32, i32
  }
  func.func @transform_1(%arg0: i32, %arg1: i32) -> (i32, i32) {
    %c0_i32 = arith.constant 0 : i32
    %c0_i32_0 = arith.constant 0 : i32
    %c0_i32_1 = arith.constant 0 : i32
    return %c0_i32, %c0_i32_0 : i32, i32
  }
  func.func @transform_2(%arg0: i32, %arg1: i32) -> (i32, i32) {
    %c0_i32 = arith.constant 0 : i32
    %c0_i32_0 = arith.constant 0 : i32
    %c0_i32_1 = arith.constant 0 : i32
    return %c0_i32, %c0_i32_0 : i32, i32
  }
  func.func @transform_3(%arg0: i32, %arg1: i32) -> (i32, i32) {
    %c0_i32 = arith.constant 0 : i32
    %c0_i32_0 = arith.constant 0 : i32
    return %arg0, %c0_i32 : i32, i32
  }
  func.func @transform_4(%arg0: i32, %arg1: i32) -> (i32, i32) {
    %c0_i32 = arith.constant 0 : i32
    %c0_i32_0 = arith.constant 0 : i32
    return %c0_i32, %arg1 : i32, i32
  }
  func.func @transform_5(%arg0: i32, %arg1: i32) -> (i32, i32) {
    %c1_i32 = arith.constant 1 : i32
    %0 = arith.muli %arg0, %c1_i32 : i32
    %1 = arith.addi %0, %arg1 : i32
    %c0_i32 = arith.constant 0 : i32
    %c0_i32_0 = arith.constant 0 : i32
    return %c0_i32, %1 : i32, i32
  }
}

module attributes {stable_mosaic.version = 11 : i64} {
  func.func @_mlp_kernel(%arg0: i32, %arg1: memref<32x256xbf16, #tpu.memory_space<vmem>>, %arg2: memref<128x32xbf16, #tpu.memory_space<vmem>>, %arg3: memref<128x1xf32, #tpu.memory_space<vmem>>, %arg4: memref<1x128xbf16, #tpu.memory_space<vmem>>, %arg5: memref<1x1xf32, #tpu.memory_space<vmem>>, %arg6: memref<1x256xf32, #tpu.memory_space<vmem>>) attributes {dimension_semantics = [#tpu.dimension_semantics<parallel>], iteration_bounds = array<i64: 2>, scalar_prefetch = 0 : i64, scratch_operands = 0 : i64, tpu.core_type = #tpu.core_type<tc>, window_params = [{transform_indices = @transform_0, window_bounds = array<i64: 32, 256>}, {pipeline_mode = #tpu.pipeline_mode<synchronous>, transform_indices = @transform_1, window_bounds = array<i64: 128, 32>}, {pipeline_mode = #tpu.pipeline_mode<synchronous>, transform_indices = @transform_2, window_bounds = array<i64: 128, 1>}, {pipeline_mode = #tpu.pipeline_mode<synchronous>, transform_indices = @transform_3, window_bounds = array<i64: 1, 128>}, {pipeline_mode = #tpu.pipeline_mode<synchronous>, transform_indices = @transform_4, window_bounds = array<i64: 1, 1>}, {transform_indices = @transform_5, window_bounds = array<i64: 1, 256>}]} {
    %c0 = arith.constant 0 : index
    %c0_0 = arith.constant 0 : index
    %0 = vector.load %arg2[%c0, %c0_0] : memref<128x32xbf16, #tpu.memory_space<vmem>>, vector<128x32xbf16>
    %c0_1 = arith.constant 0 : index
    %c0_2 = arith.constant 0 : index
    %1 = vector.load %arg1[%c0_1, %c0_2] : memref<32x256xbf16, #tpu.memory_space<vmem>>, vector<32x256xbf16>
    %cst = arith.constant dense<0.000000e+00> : vector<128x256xf32>
    %2 = tpu.matmul %0, %1, %cst {dimension_numbers = #tpu.dot_dimension_numbers<[1], [0], [0], [1], [0, 0, 1, 1], [], []>} : vector<128x32xbf16>, vector<32x256xbf16>, vector<128x256xf32> -> vector<128x256xf32>
    %c0_3 = arith.constant 0 : index
    %c0_4 = arith.constant 0 : index
    %3 = vector.load %arg3[%c0_3, %c0_4] : memref<128x1xf32, #tpu.memory_space<vmem>>, vector<128x1xf32>
    %4 = vector.broadcast %3 : vector<128x1xf32> to vector<128x256xf32>
    %5 = arith.addf %2, %4 : vector<128x256xf32>
    %cst_5 = arith.constant 0.000000e+00 : f32
    %6 = vector.broadcast %cst_5 : f32 to vector<128x256xf32>
    %7 = arith.maximumf %5, %6 : vector<128x256xf32>
    %8 = arith.truncf %7 : vector<128x256xf32> to vector<128x256xbf16>
    %c0_6 = arith.constant 0 : index
    %c0_7 = arith.constant 0 : index
    %9 = vector.load %arg4[%c0_6, %c0_7] : memref<1x128xbf16, #tpu.memory_space<vmem>>, vector<1x128xbf16>
    %cst_8 = arith.constant dense<0.000000e+00> : vector<1x256xf32>
    %10 = tpu.matmul %9, %8, %cst_8 {dimension_numbers = #tpu.dot_dimension_numbers<[1], [0], [0], [1], [0, 0, 1, 1], [], []>} : vector<1x128xbf16>, vector<128x256xbf16>, vector<1x256xf32> -> vector<1x256xf32>
    %c0_9 = arith.constant 0 : index
    %c0_10 = arith.constant 0 : index
    %11 = vector.load %arg5[%c0_9, %c0_10] : memref<1x1xf32, #tpu.memory_space<vmem>>, vector<1x1xf32>
    %12 = vector.broadcast %11 : vector<1x1xf32> to vector<1x256xf32>
    %13 = arith.addf %10, %12 : vector<1x256xf32>
    %cst_11 = arith.constant 0.000000e+00 : f32
    %14 = vector.broadcast %cst_11 : f32 to vector<1x256xf32>
    %15 = arith.maximumf %13, %14 : vector<1x256xf32>
    %c0_12 = arith.constant 0 : index
    %c0_13 = arith.constant 0 : index
    %16 = vector.load %arg6[%c0_12, %c0_13] : memref<1x256xf32, #tpu.memory_space<vmem>>, vector<1x256xf32>
    tpu.vector_store %arg6[%c0_12, %c0_13], %15 {strides = array<i32>} : memref<1x256xf32, #tpu.memory_space<vmem>>, vector<1x256xf32>,
    return
  }
  func.func @transform_0(%arg0: i32) -> (i32, i32) {
    %c0_i32 = arith.constant 0 : i32
    %c0_i32_0 = arith.constant 0 : i32
    return %c0_i32, %arg0 : i32, i32
  }
  func.func @transform_1(%arg0: i32) -> (i32, i32) {
    %c0_i32 = arith.constant 0 : i32
    %c0_i32_0 = arith.constant 0 : i32
    %c0_i32_1 = arith.constant 0 : i32
    return %c0_i32, %c0_i32_0 : i32, i32
  }
  func.func @transform_2(%arg0: i32) -> (i32, i32) {
    %c0_i32 = arith.constant 0 : i32
    %c0_i32_0 = arith.constant 0 : i32
    %c0_i32_1 = arith.constant 0 : i32
    return %c0_i32, %c0_i32_0 : i32, i32
  }
  func.func @transform_3(%arg0: i32) -> (i32, i32) {
    %c0_i32 = arith.constant 0 : i32
    %c0_i32_0 = arith.constant 0 : i32
    %c0_i32_1 = arith.constant 0 : i32
    return %c0_i32, %c0_i32_0 : i32, i32
  }
  func.func @transform_4(%arg0: i32) -> (i32, i32) {
    %c0_i32 = arith.constant 0 : i32
    %c0_i32_0 = arith.constant 0 : i32
    %c0_i32_1 = arith.constant 0 : i32
    return %c0_i32, %c0_i32_0 : i32, i32
  }
  func.func @transform_5(%arg0: i32) -> (i32, i32) {
    %c0_i32 = arith.constant 0 : i32
    %c0_i32_0 = arith.constant 0 : i32
    return %c0_i32, %arg0 : i32, i32
  }
}

</mosaic_0001>

<bundles_post_ra>
// kernel: custom-call.1
= control target key start
LH: loop header
LB: loop body
LE: loop exit
PB: predicated region body
PF: predicated region fallthrough
CT: control target
= control target key end

     0   :  { %s51_s0 = inlined_call_operand.hbm [shape: c64[32,32,2,2], index: 0, kind: input, shape index: {}]   ;;  %s52_s1 = inlined_call_operand.vmem [shape: f32[32,32,2,2], index: 1, kind: output, shape index: {}]  }
   0x1   :  { %s2_s8 = scalar_lea.hbm %s51_s0, 2048 }
   0x2   :  { %3 = vsyncpa [#allocation0], 0  ;;  %s4_s11 = sshll.u32 %s52_s1, 4  ;;  %s5_s11 = int_to_ptr.vmem [resolvable:$true] %s4_s11 }
   0x3   :  { %s20_s12 = scalar_lea.vmem %s5_s11, 2048  ;;  %p25_p1 = scmp.lt.s32.totalorder %s5_s11, %s5_s11 }
   0x4   :  { %p21_p0 = scmp.ne.s32.totalorder %s5_s11, %s20_s12  ;;  %p26_p2 = scmp.lt.s32.totalorder %s20_s12, %s20_s12 }
   0x6   :  { %p27_p3 = por %p26_p2, %p25_p1 }
   0x8   :  { %p28_p4 = pnand %p27_p3, %p21_p0 }
   0xa   :  { %31 = shalt.err (!%p28_p4)  }
   0xb   :  { %7 = dma.hbm_to_vmem [thread:$0]  %s2_s8, 2048, %s5_s11, [#allocation0] }
   0xc   :  { %33 = dma.done.wait [#allocation0], 2048  }
   0xd   :  { %34 = vsyncadd [#allocation0], 4294965248 }
   0xe   :  { %9 = vsyncpa [#allocation0], 1 }

// kernel: custom-call
= control target key start
LH: loop header
LB: loop body
LE: loop exit
PB: predicated region body
PF: predicated region fallthrough
CT: control target
= control target key end

     0   :  { %2 = vsyncpa [#allocation0], 0  ;;  %s47_s0 = inlined_call_operand.hbm [shape: c64[32,32,2,2], index: 0, kind: input, shape index: {}]   ;;  %s48_s1 = inlined_call_operand.vmem [shape: f32[32,32,2,2], index: 1, kind: output, shape index: {}]  }
   0x1   :  { %s3_s8 = sshll.u32 %s48_s1, 4  ;;  %s4_s8 = int_to_ptr.vmem [resolvable:$true] %s3_s8 }
   0x2   :  { %s17_s9 = scalar_lea.vmem %s4_s8, 2048  ;;  %p22_p1 = scmp.lt.s32.totalorder %s4_s8, %s4_s8 }
   0x3   :  { %p18_p0 = scmp.ne.s32.totalorder %s4_s8, %s17_s9  ;;  %p23_p2 = scmp.lt.s32.totalorder %s17_s9, %s17_s9 }
   0x5   :  { %p24_p3 = por %p23_p2, %p22_p1 }
   0x7   :  { %p25_p4 = pnand %p24_p3, %p18_p0 }
   0x9   :  { %28 = shalt.err (!%p25_p4)  }
   0xa   :  { %6 = dma.hbm_to_vmem [thread:$0]  %s47_s0, 2048, %s4_s8, [#allocation0] }
   0xb   :  { %29 = dma.done.wait [#allocation0], 2048  }
   0xc   :  { %30 = vsyncadd [#allocation0], 4294965248 }
   0xd   :  { %8 = vsyncpa [#allocation0], 1 }

// kernel: net3d_forward.11
= control target key start
LH: loop header
LB: loop body
LE: loop exit
PB: predicated region body
PF: predicated region fallthrough
CT: control target
= control target key end

     0   :  { %s658_s9 = smov 0   ;;  %s660_s10 = smov 0   ;;  %s827_s0 = inlined_call_operand.vmem [shape: bf16[32,512], index: 0, kind: input, shape index: {}]   ;;  %s828_s1 = inlined_call_operand.vmem [shape: f32[256,16], index: 1, kind: input, shape index: {}]   ;;  %s829_s2 = inlined_call_operand.vmem [shape: f32[64,16], index: 2, kind: output, shape index: {}]  }
   0x1   :  { %s662_s11 = smov 0   ;;  %s664_s12 = smov 0  }
   0x2   :  { %s666_s13 = smov 0  }
   0x3 LB: > { %s24_s14 = sadd.s32 1, %s636_s12  ;;  %p40_p1 = scmp.ne.s32.totalorder %s628_s10, %s624_s9  ;;  %s640_s13 = sphi %s666_s13, %s12_s13   ;;  %s636_s12 = sphi %s664_s12, %s833_s12   ;;  %s632_s11 = sphi %s662_s11, %s832_s11   ;;  %s628_s10 = sphi %s660_s10, %s831_s10   ;;  %s624_s9 = sphi %s658_s9, %s830_s9  }
   0x4   : > { %p26_p0 = scmp.ge.s32.totalorder %s24_s14, 2  ;;  %p41_p2 = scmp.eq.s32.totalorder %s640_s13, 0 }
   0x5   : > { %s33_s16 = sadd.s32 1, %s628_s10  ;;  %p474_p5 = scmp.ge.s32.totalorder %s640_s13, 2 }
   0x6   : > { %s835_s14 = smov (%p26_p0, %s24_s14), 0  ;;  %p42_p3 = por %p41_p2, %p40_p1 }
   0x7   : > { %s30_s15 = ssub.s32 %s636_s12, %s835_s14  ;;  %127 = sbr.rel (%p474_p5) target bundleno = 18 (0x12), region = 20 }
   0x8   : > { %p31_p4 = scmp.eq.s32.totalorder %s30_s15, 0 }
   0xa   : > { %s693_s17 = scalar_select %p31_p4, %s628_s10, %s33_s16  }
   0xc   : > { %130 = sbr.rel (!%p42_p3) target bundleno = 18 (0x12), region = 24  ;;  %s132_s18 = sand.u32 (%p42_p3), 1, %s628_s10  }
   0xd   : > { %s484_s19 = sshll.u32 (%p42_p3), %s636_s12, 3  ;;  %s475_s20 = sshll.u32 (%p42_p3), %s132_s18, 5 }
   0xe   : > { %s138_s23 = scalar_lea.vmem (%p42_p3), %s827_s0, %s484_s19  ;;  %s134_s24 = scalar_lea.vmem (%p42_p3), [#allocation2], %s475_s20 }
   0xf   : > { %v173_v0 = vld [vmem:[%s138_s23] sm:$0xff] (%p42_p3)  ;;  %v175_v1 = vld [vmem:[%s138_s23 + $0x10] sm:$0xff] (%p42_p3) }
  0x10   : > { %v177_v2 = vld [vmem:[%s138_s23 + $0x20] sm:$0xff] (%p42_p3)  ;;  %174 = vst [vmem:[%s134_s24] sm:$0xff] (%p42_p3), %v173_v0  ;;  %176 = vst [vmem:[%s134_s24 + $0x8] sm:$0xff] (%p42_p3), %v175_v1  ;;  %v179_v3 = vld [vmem:[%s138_s23 + $0x30] sm:$0xff] (%p42_p3) }
  0x11   : > { %178 = vst [vmem:[%s134_s24 + $0x10] sm:$0xff] %v177_v2  ;;  %180 = vst [vmem:[%s134_s24 + $0x18] sm:$0xff] %v179_v3 }
  0x12 PF: > { %p478_p6 = scmp.ge.s32.totalorder %s640_s13, 1  ;;  %p185_p7 = scmp.lt.s32.totalorder %s640_s13, 3 }
  0x14   : > { %p186_p8 = pnand %p478_p6, %p185_p7 }
  0x15   : > { %s192_s23 = sand.u32 (!%p186_p8), 1, %s624_s9   ;;  %s480_s28 = sshll.u32 (!%p186_p8), %s632_s11, 2 }
  0x16   : > { %189 = sbr.rel (%p186_p8) target bundleno = 265 (0x109), region = 62  ;;  %s479_s30 = sshll.u32 (!%p186_p8), %s192_s23, 5 }
  0x17   : > { %s194_s21 = scalar_lea.vmem (!%p186_p8), [#allocation2], %s479_s30  ;;  %p227_p9 = scmp.lt.s32.totalorder (!%p186_p8), %s480_s28, 7 }
  0x1b   : > { %v288_v4 = vld [vmem:[%s828_s1 + $0xf8] sm:$0xff]  ;;  %v287_v6 = vld [vmem:[%s828_s1 + $0xf0] sm:$0xff]  ;;  %v286_v8 = vld [vmem:[%s828_s1 + $0xe8] sm:$0xff]  ;;  %s837_s28 = smov (!%p227_p9, %s480_s28), 7  ;;  %vm236_vm0 = vcmask 130048   ;;  %v642_v48 = vmov 0.0  }
  0x1c   : > { %v272_v5 = vld [vmem:[%s828_s1 + $0x78] sm:$0xff]  ;;  %485 = vmatprep.subr.mxu0 %v288_v4  ;;  %529 = vmatprep.subr.mxu1 %v288_v4  ;;  %v271_v7 = vld [vmem:[%s828_s1 + $0x70] sm:$0xff]  ;;  %v270_v9 = vld [vmem:[%s828_s1 + $0x68] sm:$0xff]  ;;  %s481_s29 = sshll.u32 %s837_s28, 3 }
  0x1d   : > { %486 = vmatpush3.msra.mxu0 %v272_v5  ;;  %545 = vmatpush3.msra.mxu1 %v272_v5  ;;  %v285_v10 = vld [vmem:[%s828_s1 + $0xe0] sm:$0xff]  ;;  %v284_v12 = vld [vmem:[%s828_s1 + $0xd8] sm:$0xff]  ;;  %v283_v14 = vld [vmem:[%s828_s1 + $0xd0] sm:$0xff]  ;;  %s230_s3 = scalar_lea.vmem %s829_s2, %s481_s29 }
  0x1e   : > { %487 = vmatprep.subr.mxu0 %v287_v6  ;;  %530 = vmatprep.subr.mxu1 %v287_v6  ;;  %v269_v11 = vld [vmem:[%s828_s1 + $0x60] sm:$0xff]  ;;  %v268_v13 = vld [vmem:[%s828_s1 + $0x58] sm:$0xff]  ;;  %v267_v15 = vld [vmem:[%s828_s1 + $0x50] sm:$0xff]  ;;  %237 = vst.msk [vmem:[%s230_s3] sm:$0xff] %vm236_vm0, %v642_v48 }
  0x1f   : > { %488 = vmatpush3.msra.mxu0 %v271_v7  ;;  %546 = vmatpush3.msra.mxu1 %v271_v7  ;;  %v282_v16 = vld [vmem:[%s828_s1 + $0xc8] sm:$0xff]  ;;  %v281_v18 = vld [vmem:[%s828_s1 + $0xc0] sm:$0xff]  ;;  %v280_v20 = vld [vmem:[%s828_s1 + $0xb8] sm:$0xff]  ;;  %238 = vst.msk [vmem:[%s230_s3 + $0x8] sm:$0xff] %vm236_vm0, %v642_v48 }
  0x20   : > { %489 = vmatprep.subr.mxu0 %v286_v8  ;;  %531 = vmatprep.subr.mxu1 %v286_v8  ;;  %v266_v17 = vld [vmem:[%s828_s1 + $0x48] sm:$0xff]  ;;  %v265_v19 = vld [vmem:[%s828_s1 + $0x40] sm:$0xff]  ;;  %v264_v21 = vld [vmem:[%s828_s1 + $0x38] sm:$0xff]  ;;  %239 = vst.msk [vmem:[%s230_s3 + $0x10] sm:$0xff] %vm236_vm0, %v642_v48 }
  0x21   : > { %490 = vmatpush3.msra.mxu0 %v270_v9  ;;  %547 = vmatpush3.msra.mxu1 %v270_v9  ;;  %v279_v22 = vld [vmem:[%s828_s1 + $0xb0] sm:$0xff]  ;;  %v278_v24 = vld [vmem:[%s828_s1 + $0xa8] sm:$0xff]  ;;  %v277_v26 = vld [vmem:[%s828_s1 + $0xa0] sm:$0xff]  ;;  %240 = vst.msk [vmem:[%s230_s3 + $0x18] sm:$0xff] %vm236_vm0, %v642_v48 }
  0x22   : > { %491 = vmatprep.subr.mxu0 %v285_v10  ;;  %532 = vmatprep.subr.mxu1 %v285_v10  ;;  %v263_v23 = vld [vmem:[%s828_s1 + $0x30] sm:$0xff]  ;;  %v262_v25 = vld [vmem:[%s828_s1 + $0x28] sm:$0xff]  ;;  %v261_v27 = vld [vmem:[%s828_s1 + $0x20] sm:$0xff] }
  0x23   : > { %492 = vmatpush3.msra.mxu0 %v269_v11  ;;  %548 = vmatpush3.msra.mxu1 %v269_v11  ;;  %v276_v28 = vld [vmem:[%s828_s1 + $0x98] sm:$0xff]  ;;  %v275_v30 = vld [vmem:[%s828_s1 + $0x90] sm:$0xff]  ;;  %v274_v32 = vld [vmem:[%s828_s1 + $0x88] sm:$0xff] }
  0x24   : > { %493 = vmatprep.subr.mxu0 %v284_v12  ;;  %533 = vmatprep.subr.mxu1 %v284_v12  ;;  %v260_v29 = vld [vmem:[%s828_s1 + $0x18] sm:$0xff]  ;;  %v259_v31 = vld [vmem:[%s828_s1 + $0x10] sm:$0xff]  ;;  %v245_v33 = vld [vmem:[%s194_s21] sm:$0xff] }
  0x25   : > { %494 = vmatpush3.msra.mxu0 %v268_v13  ;;  %549 = vmatpush3.msra.mxu1 %v268_v13  ;;  %v247_v34 = vld [vmem:[%s194_s21 + $0x10] sm:$0xff]  ;;  %v258_v35 = vld [vmem:[%s828_s1 + $0x8] sm:$0xff]  ;;  %v273_v36 = vld [vmem:[%s828_s1 + $0x80] sm:$0xff]  ;;  %v250_v40 = vunpack.c.h.bf16 %v245_v33  ;;  %v249_v42 = vunpack.c.l.bf16 %v245_v33 }
  0x26   : > { %495 = vmatprep.subr.mxu0 %v283_v14  ;;  %534 = vmatprep.subr.mxu1 %v283_v14  ;;  %v246_v37 = vld [vmem:[%s194_s21 + $0x8] sm:$0xff]  ;;  %v248_v38 = vld [vmem:[%s194_s21 + $0x18] sm:$0xff]  ;;  %v257_v39 = vld [vmem:[%s828_s1] sm:$0xff]  ;;  %v254_v41 = vunpack.c.h.bf16 %v247_v34  ;;  %v253_v43 = vunpack.c.l.bf16 %v247_v34 }
  0x27   : > { %496 = vmatpush3.msra.mxu0 %v267_v15  ;;  %550 = vmatpush3.msra.mxu1 %v267_v15  ;;  %v252_v44 = vunpack.c.h.bf16 %v246_v37  ;;  %v256_v45 = vunpack.c.h.bf16 %v248_v38  ;;  %v251_v46 = vunpack.c.l.bf16 %v246_v37  ;;  %v255_v47 = vunpack.c.l.bf16 %v248_v38  ;;  %v241_v51 = vld [vmem:[%s230_s3] sm:$0xff]  ;;  %v242_v57 = vld [vmem:[%s230_s3 + $0x8] sm:$0xff]  ;;  %v243_v60 = vld [vmem:[%s230_s3 + $0x10] sm:$0xff] }
  0x28   : > { %497 = vmatprep.subr.mxu0 %v282_v16  ;;  %535 = vmatprep.subr.mxu1 %v282_v16  ;;  %v244_v58 = vld [vmem:[%s230_s3 + $0x18] sm:$0xff] }
  0x29   : > { %498 = vmatpush3.msra.mxu0 %v266_v17  ;;  %551 = vmatpush3.msra.mxu1 %v266_v17 }
  0x2a   : > { %499 = vmatprep.subr.mxu0 %v281_v18  ;;  %536 = vmatprep.subr.mxu1 %v281_v18 }
  0x2b   : > { %500 = vmatpush3.msra.mxu0 %v265_v19  ;;  %552 = vmatpush3.msra.mxu1 %v265_v19 }
  0x2c   : > { %501 = vmatprep.subr.mxu0 %v280_v20  ;;  %537 = vmatprep.subr.mxu1 %v280_v20 }
  0x2d   : > { %502 = vmatpush3.msra.mxu0 %v264_v21  ;;  %553 = vmatpush3.msra.mxu1 %v264_v21 }
  0x2e   : > { %503 = vmatprep.subr.mxu0 %v279_v22  ;;  %538 = vmatprep.subr.mxu1 %v279_v22 }
  0x2f   : > { %504 = vmatpush3.msra.mxu0 %v263_v23  ;;  %554 = vmatpush3.msra.mxu1 %v263_v23 }
  0x30   : > { %505 = vmatprep.subr.mxu0 %v278_v24  ;;  %539 = vmatprep.subr.mxu1 %v278_v24 }
  0x31   : > { %506 = vmatpush3.msra.mxu0 %v262_v25  ;;  %555 = vmatpush3.msra.mxu1 %v262_v25 }
  0x32   : > { %507 = vmatprep.subr.mxu0 %v277_v26  ;;  %540 = vmatprep.subr.mxu1 %v277_v26 }
  0x33   : > { %508 = vmatpush3.msra.mxu0 %v261_v27  ;;  %556 = vmatpush3.msra.mxu1 %v261_v27 }
  0x34   : > { %509 = vmatprep.subr.mxu0 %v276_v28  ;;  %541 = vmatprep.subr.mxu1 %v276_v28 }
  0x35   : > { %510 = vmatpush3.msra.mxu0 %v260_v29  ;;  %557 = vmatpush3.msra.mxu1 %v260_v29 }
  0x36   : > { %511 = vmatprep.subr.mxu0 %v275_v30  ;;  %542 = vmatprep.subr.mxu1 %v275_v30 }
  0x37   : > { %512 = vmatpush3.msra.mxu0 %v259_v31  ;;  %558 = vmatpush3.msra.mxu1 %v259_v31 }
  0x38   : > { %513 = vmatprep.subr.mxu0 %v274_v32  ;;  %543 = vmatprep.subr.mxu1 %v274_v32 }
  0x39   : > { %514 = vmatpush3.msra.mxu0 %v258_v35  ;;  %559 = vmatpush3.msra.mxu1 %v258_v35 }
  0x3a   : > { %515 = vmatprep.subr.mxu0 %v273_v36  ;;  %544 = vmatprep.subr.mxu1 %v273_v36 }
  0x3b   : > { %516 = vmatpush3.msra.mxu0 %v257_v39  ;;  %560 = vmatpush3.msra.mxu1 %v257_v39 }
  0x3c   : > { %353 = vmatprep.mubr.f32.mxu0 %v250_v40  ;;  %363 = vmatprep.mubr.f32.mxu1 %v254_v41 }
  0x3d   : > { %354 = vmatmul.mubr.f32.vlgmr.msra.gmra.mxu0 %v249_v42  ;;  %364 = vmatmul.mubr.f32.vlgmr.msra.gmra.mxu1 %v253_v43 }
  0x3e   : > { %358 = vmatprep.mubr.f32.mxu0 %v252_v44  ;;  %368 = vmatprep.mubr.f32.mxu1 %v256_v45 }
  0x41   : > { %359 = vmatmul.mubr.f32.gmra.mxu0 %v251_v46  ;;  %369 = vmatmul.mubr.f32.gmra.mxu1 %v255_v47 }
  0xfd   : > { %v517_v49 = vpop.f32.mrf.mxu0  ;;  %v523_v50 = vpop.f32.mrf.mxu1 }
  0xff   : > { %v518_v52 = vpop.f32.mrf.mxu0  ;;  %v524_v53 = vpop.f32.mrf.mxu1 }
 0x100   : > { %v519_v54 = vadd.f32 %v518_v52, %v517_v49  ;;  %v525_v61 = vadd.f32 %v524_v53, %v523_v50 }
 0x101   : > { %v520_v55 = vpop.f32.mrf.mxu0  ;;  %v526_v56 = vpop.f32.mrf.mxu1 }
 0x102   : > { %v374_v59 = vadd.f32 %v519_v54, %v241_v51  ;;  %v376_v3 = vadd.f32 %v525_v61, %v243_v60 }
 0x103   : > { %v521_v62 = vpop.f32.mrf.mxu0  ;;  %v527_v63 = vpop.f32.mrf.mxu1 }
 0x104   : > { %v522_v0 = vadd.f32 %v521_v62, %v520_v55  ;;  %v528_v1 = vadd.f32 %v527_v63, %v526_v56  ;;  %379 = vst.msk [vmem:[%s230_s3] sm:$0xff] %vm236_vm0, %v374_v59  ;;  %381 = vst.msk [vmem:[%s230_s3 + $0x10] sm:$0xff] %vm236_vm0, %v376_v3 }
 0x106   : > { %v375_v2 = vadd.f32 %v522_v0, %v242_v57  ;;  %v377_v4 = vadd.f32 %v528_v1, %v244_v58 }
 0x108   : > { %380 = vst.msk [vmem:[%s230_s3 + $0x8] sm:$0xff] %vm236_vm0, %v375_v2  ;;  %382 = vst.msk [vmem:[%s230_s3 + $0x18] sm:$0xff] %vm236_vm0, %v377_v4 }
 0x109 PF: > { %s12_s13 = sadd.s32 1, %s640_s13   ;;  %s830_s9 = smov %s628_s10 }
 0x10a   : > { %p9_p10 = scmp.ge.s32.totalorder %s12_s13, 4   ;;  %s831_s10 = smov %s693_s17 }
 0x10b   : > { %s832_s11 = smov %s636_s12  ;;  %s833_s12 = smov %s835_s14 }
 0x10c   :  { %11 = sbr.rel (!%p9_p10) target bundleno = 3 (0x3), region = 108 }

// kernel: net3d_forward.10
= control target key start
LH: loop header
LB: loop body
LE: loop exit
PB: predicated region body
PF: predicated region fallthrough
CT: control target
= control target key end

     0   :  { %s554_s12 = smov 0   ;;  %s556_s13 = smov 0   ;;  %s622_s0 = inlined_call_operand.vmem [shape: bf16[2,512], index: 0, kind: input, shape index: {}]   ;;  %s623_s1 = inlined_call_operand.vmem [shape: bf16[32,2], index: 1, kind: input, shape index: {}]   ;;  %s624_s2 = inlined_call_operand.vmem [shape: f32[32,1], index: 2, kind: input, shape index: {}]   ;;  %s625_s3 = inlined_call_operand.vmem [shape: bf16[32,512], index: 3, kind: output, shape index: {}]  }
   0x1   :  { %s558_s14 = smov 0  }
   0x2 LB: > { %s567_s15 = sadd.s32 4294967295, %s530_s14   ;;  %s569_s16 = sadd.s32 1, %s530_s14   ;;  %s530_s14 = sphi %s558_s14, %s629_s14   ;;  %s526_s13 = sphi %s556_s13, %s628_s13   ;;  %s522_s12 = sphi %s554_s12, %s627_s12  }
   0x3   : > { %s85_s17 = ssub.s32 %s530_s14, %s569_s16  ;;  %s88_s18 = sadd.s32 1, %s526_s13 }
   0x4   : > { %p86_p0 = scmp.eq.s32.totalorder %s85_s17, 0  ;;  %p98_p1 = scmp.ne.s32.totalorder %s526_s13, %s522_s12 }
   0x5   : > { %p99_p2 = scmp.eq.s32.totalorder %s567_s15, 1  ;;  %p437_p3 = scmp.ge.s32.totalorder %s530_s14, 1 }
   0x6   : > { %s577_s19 = scalar_select %p86_p0, %s526_s13, %s88_s18  }
   0x7   : > { %p579_p4 = por %p99_p2, %p98_p1  ;;  %p137_p5 = scmp.lt.s32.totalorder %s530_s14, 3 }
   0x9   : > { %p138_p6 = pnand %p437_p3, %p137_p5 }
   0xa   : > { %s439_s21 = sshll.u32 (!%p138_p6), %s567_s15, 1  ;;  %s156_s10 = sand.u32 (!%p138_p6), 1, %s522_s12  }
   0xb   : > { %141 = sbr.rel (%p138_p6) target bundleno = 256 (0x100), region = 32  ;;  %p160_p7 = scmp.lt.s32.totalorder (!%p138_p6), %s439_s21, 3 }
   0xc   : > { %s438_s11 = sshll.u32 (!%p138_p6), %s156_s10, 5 }
   0xd   : > { %s158_s14 = scalar_lea.vmem (!%p138_p6), [#allocation2], %s438_s11 }
  0x10   : > { %v217_v0 = vlaneseq  ;;  %v532_v1 = vmov 1966171168   ;;  %v533_v3 = vmov 0   ;;  %s631_s21 = smov (!%p160_p7, %s439_s21), 3  ;;  %v173_v6 = vld [vmem:[%s624_s2 + $0x10] sm:$0xff]  ;;  %v171_v7 = vld [vmem:[%s624_s2] sm:$0xff] }
  0x11   : > { %v215_v2 = vunpack.c.l.s4 %v532_v1  ;;  %274 = vmatprep.mubr.bf16.mxu0 %v533_v3  ;;  %284 = vmatprep.mubr.bf16.mxu1 %v533_v3  ;;  %s162_s28 = scalar_lea.vmem %s622_s0, %s631_s21  ;;  %v174_v9 = vld [vmem:[%s624_s2 + $0x18] sm:$0xff]  ;;  %v172_v10 = vld [vmem:[%s624_s2 + $0x8] sm:$0xff]  ;;  %vm235_vm0 = vcmask 1040384   ;;  %v490_v16 = vld [vmem:[%s623_s1] sm:$0xff]   ;;  %vm228_vm1 = vcmask 15360   ;;  %s459_s12 = sshll.u32 (%p579_p4), %s567_s15, 3 }
  0x12   : > { %v218_v4 = vshrl.u32 %v217_v0, 7  ;;  %489 = vset.pattern.permute.xlu1 %v533_v3  ;;  %488 = vset.pattern.permute.xlu0 %v533_v3  ;;  %v442_v11 = vld.sshfl [vmem:[%s162_s28] sm:$0x11 pattern:$0x75316420]  ;;  %v491_v17 = vld [vmem:[%s623_s1 + $0x8] sm:$0xff]   ;;  %s340_s21 = scalar_lea.vmem (%p579_p4), %s625_s3, %s459_s12 }
  0x13   : > { %v216_v5 = vunpack.c.0.s8 %v215_v2  ;;  %187 = vperm.xlu1 %489, %v173_v6   ;;  %177 = vperm.xlu0 %488, %v171_v7   ;;  %v213_v12 = vcombine.high %v442_v11, %v442_v11 }
  0x15   : > { %v219_v8 = vsub.s32 %v216_v5, %v218_v4 }
  0x17   : > { %v220_v13 = vrot.slane %v442_v11, %v219_v8  ;;  %192 = vperm.xlu1 %489, %v174_v9   ;;  %182 = vperm.xlu0 %488, %v172_v10   ;;  %v227_v14 = vrot.slane %v213_v12, %v219_v8 }
  0x19   : > { %v237_v15 = vsel %vm235_vm0, %v220_v13, 0  ;;  %443 = vmatprep.subr.msk.bf16.mxu0 %vm235_vm0, %v227_v14  ;;  %460 = vmatprep.subr.msk.bf16.mxu1 %vm235_vm0, %v227_v14 }
  0x1a   : > { %257 = vmatpush1.bf16.msra.mxu0 %v237_v15  ;;  %461 = vmatpush1.bf16.msra.mxu1 %v237_v15 }
  0x1d   : > { %444 = vmatmul.mubr.msk.bf16.vlgmr.msra.gmra.mxu0 %vm228_vm1, %v490_v16  ;;  %445 = vmatmul.mubr.msk.bf16.vlgmr.msra.gmra.mxu1 %vm228_vm1, %v491_v17 }
  0x8e   : > { %v188_v18 = vpop.permute.xlu1 %187  ;;  %v178_v19 = vpop.permute.xlu0 %177 }
  0x92   : > { %v193_v26 = vpop.permute.xlu1 %192  ;;  %v183_v27 = vpop.permute.xlu0 %182 }
  0xdd   : > { %v276_v20 = vpop.f32.mrf.mxu0  ;;  %v286_v21 = vpop.f32.mrf.mxu1 }
  0xde   : > { %v277_v22 = vadd.f32 %v276_v20, %v178_v19  ;;  %v287_v23 = vadd.f32 %v286_v21, %v188_v18 }
  0xdf   : > { %v278_v24 = vpop.f32.mrf.mxu0  ;;  %v288_v25 = vpop.f32.mrf.mxu1 }
  0xe0   : > { %492 = vtanh.f32 %v277_v22  ;;  %v279_v28 = vadd.f32 %v278_v24, %v178_v19  ;;  %v289_v29 = vadd.f32 %v288_v25, %v188_v18 }
  0xe1   : > { %494 = vtanh.f32 %v287_v23  ;;  %v280_v30 = vpop.f32.mrf.mxu0  ;;  %v290_v31 = vpop.f32.mrf.mxu1 }
  0xe2   : > { %496 = vtanh.f32 %v279_v28  ;;  %v281_v32 = vadd.f32 %v280_v30, %v183_v27  ;;  %v291_v33 = vadd.f32 %v290_v31, %v193_v26 }
  0xe3   : > { %498 = vtanh.f32 %v289_v29  ;;  %v282_v34 = vpop.f32.mrf.mxu0  ;;  %v292_v35 = vpop.f32.mrf.mxu1 }
  0xe4   : > { %500 = vtanh.f32 %v281_v32  ;;  %v283_v36 = vadd.f32 %v282_v34, %v183_v27  ;;  %v293_v37 = vadd.f32 %v292_v35, %v193_v26 }
  0xe5   : > { %502 = vtanh.f32 %v291_v33 }
  0xe6   : > { %504 = vtanh.f32 %v283_v36 }
  0xe7   : > { %506 = vtanh.f32 %v293_v37 }
  0xed   : > { %v493_v38 = vpop.eup %492 }
  0xee   : > { %v495_v39 = vpop.eup %494 }
  0xef   : > { %v497_v40 = vpop.eup %496 }
  0xf0   : > { %v499_v41 = vpop.eup %498  ;;  %v455_v42 = vpack.c.bf16 %v497_v40, %v493_v38 }
  0xf1   : > { %v501_v43 = vpop.eup %500  ;;  %v457_v44 = vpack.c.bf16 %v499_v41, %v495_v39 }
  0xf2   : > { %v503_v45 = vpop.eup %502  ;;  %327 = vst [vmem:[%s158_s14] sm:$0xff] %v455_v42 }
  0xf3   : > { %v505_v46 = vpop.eup %504  ;;  %329 = vst [vmem:[%s158_s14 + $0x10] sm:$0xff] %v457_v44  ;;  %337 = sbr.rel (!%p579_p4) target bundleno = 256 (0x100), region = 36 }
  0xf4   : > { %v507_v47 = vpop.eup %506  ;;  %v456_v48 = vpack.c.bf16 %v505_v46, %v501_v43 }
  0xf5   : > { %v458_v49 = vpack.c.bf16 %v507_v47, %v503_v45 }
  0xf6   : > { %328 = vst [vmem:[%s158_s14 + $0x8] sm:$0xff] %v456_v48 }
  0xf7   : > { %330 = vst [vmem:[%s158_s14 + $0x18] sm:$0xff] %v458_v49 }
  0xf9   : > { %v375_v50 = vld [vmem:[%s158_s14] sm:$0xff] }
  0xfa   : > { %v379_v52 = vld [vmem:[%s158_s14 + $0x10] sm:$0xff]  ;;  %376 = vst [vmem:[%s340_s21] sm:$0xff] %v375_v50 }
  0xfb   : > { %380 = vst [vmem:[%s340_s21 + $0x20] sm:$0xff] %v379_v52 }
  0xfd   : > { %v377_v51 = vld [vmem:[%s158_s14 + $0x8] sm:$0xff] }
  0xfe   : > { %v381_v53 = vld [vmem:[%s158_s14 + $0x18] sm:$0xff]  ;;  %378 = vst [vmem:[%s340_s21 + $0x10] sm:$0xff] %v377_v51 }
  0xff   : > { %382 = vst [vmem:[%s340_s21 + $0x30] sm:$0xff] %v381_v53 }
 0x100 PF: > { %p10_p8 = scmp.ge.s32.totalorder %s569_s16, 4   ;;  %s627_s12 = smov %s526_s13 }
 0x101   : > { %s628_s13 = smov %s577_s19  ;;  %s629_s14 = smov %s569_s16 }
 0x102   :  { %12 = sbr.rel (!%p10_p8) target bundleno = 2 (0x2), region = 100 }

// kernel: net3d_forward.12
= control target key start
LH: loop header
LB: loop body
LE: loop exit
PB: predicated region body
PF: predicated region fallthrough
CT: control target
= control target key end

     0   :  { %s739_s15 = smov 0   ;;  %s741_s16 = smov 0   ;;  %s860_s0 = inlined_call_operand.vmem [shape: f32[64,32], index: 0, kind: input, shape index: {}]   ;;  %s861_s1 = inlined_call_operand.vmem [shape: f32[32,256], index: 1, kind: input, shape index: {}]   ;;  %s862_s2 = inlined_call_operand.vmem [shape: f32[32,1], index: 2, kind: input, shape index: {}]   ;;  %s863_s3 = inlined_call_operand.vmem [shape: f32[32,1], index: 3, kind: input, shape index: {}]   ;;  %s864_s4 = inlined_call_operand.vmem [shape: bf16[32,512], index: 4, kind: output, shape index: {}]  }
   0x1   :  { %s743_s17 = smov 0   ;;  %s745_s18 = smov 0  }
   0x2   :  { %s747_s19 = smov 0  }
   0x3 LB: > { %s577_s20 = sadd.s32 4294967295, %s710_s19   ;;  %s26_s21 = sadd.s32 1, %s706_s18  ;;  %s710_s19 = sphi %s747_s19, %s14_s19   ;;  %s706_s18 = sphi %s745_s18, %s869_s18   ;;  %s702_s17 = sphi %s743_s17, %s868_s17   ;;  %s698_s16 = sphi %s741_s16, %s867_s16   ;;  %s694_s15 = sphi %s739_s15, %s866_s15  }
   0x4   : > { %p28_p0 = scmp.ge.s32.totalorder %s26_s21, 2  ;;  %s129_s22 = sadd.s32 1, %s698_s16 }
   0x5   : > { %p139_p1 = scmp.ne.s32.totalorder %s698_s16, %s694_s15  ;;  %p140_p2 = scmp.eq.s32.totalorder %s577_s20, 1 }
   0x6   : > { %s871_s21 = smov (%p28_p0, %s26_s21), 0  ;;  %p582_p4 = scmp.ge.s32.totalorder %s710_s19, 1 }
   0x7   : > { %p771_p3 = por %p140_p2, %p139_p1  ;;  %s126_s24 = ssub.s32 %s706_s18, %s871_s21 }
   0x8   : > { %p188_p5 = scmp.lt.s32.totalorder %s710_s19, 3  ;;  %p127_p6 = scmp.eq.s32.totalorder %s126_s24, 0 }
   0xa   : > { %p189_p7 = pnand %p582_p4, %p188_p5 }
   0xb   : > { %s780_s25 = scalar_select %p127_p6, %s698_s16, %s129_s22  }
   0xc   : > { %192 = sbr.rel (%p189_p7) target bundleno = 256 (0x100), region = 36  ;;  %s584_s6 = sshll.u32 (!%p189_p7), %s702_s17, 2 }
   0xd   : > { %p219_p8 = scmp.lt.s32.totalorder (!%p189_p7), %s584_s6, 7  ;;  %s215_s27 = sand.u32 (!%p189_p7), 1, %s694_s15  }
  0x11   : > { %v243_v0 = vld [vmem:[%s861_s1 + $0x38] sm:$0xff]  ;;  %v242_v1 = vld [vmem:[%s861_s1 + $0x30] sm:$0xff]  ;;  %v241_v2 = vld [vmem:[%s861_s1 + $0x28] sm:$0xff]  ;;  %s873_s6 = smov (!%p219_p8, %s584_s6), 7  ;;  %vm244_vm0 = vcmask 261120   ;;  %v712_v10 = vmov 0.0  }
  0x12   : > { %281 = vmatprep.subr.mxu0 %v243_v0  ;;  %604 = vmatprep.subr.mxu1 %v243_v0  ;;  %v240_v3 = vld [vmem:[%s861_s1 + $0x20] sm:$0xff]  ;;  %v239_v4 = vld [vmem:[%s861_s1 + $0x18] sm:$0xff]  ;;  %v238_v5 = vld [vmem:[%s861_s1 + $0x10] sm:$0xff]  ;;  %s585_s24 = sshll.u32 %s873_s6, 3  ;;  %v713_v15 = vmov 0   ;;  %s603_s15 = sshll.u32 (%p771_p3), %s702_s17, 3 }
  0x13   : > { %282 = vmatpush1.msra.mxu0 %v242_v1  ;;  %608 = vmatpush1.msra.mxu1 %v242_v1  ;;  %v237_v6 = vld [vmem:[%s861_s1 + $0x8] sm:$0xff]  ;;  %v236_v7 = vld [vmem:[%s861_s1] sm:$0xff]  ;;  %s222_s28 = scalar_lea.vmem %s860_s0, %s585_s24  ;;  %v348_v11 = vld [vmem:[%s862_s2 + $0x10] sm:$0xff]  ;;  %s456_s6 = scalar_lea.vmem (%p771_p3), %s864_s4, %s603_s15 }
  0x14   : > { %283 = vmatprep.subr.mxu0 %v241_v2  ;;  %605 = vmatprep.subr.mxu1 %v241_v2  ;;  %v232_v8 = vld [vmem:[%s222_s28] sm:$0xff]  ;;  %v234_v9 = vld [vmem:[%s222_s28 + $0x10] sm:$0xff]  ;;  %v233_v13 = vld [vmem:[%s222_s28 + $0x8] sm:$0xff] }
  0x15   : > { %284 = vmatpush1.msra.mxu0 %v240_v3  ;;  %609 = vmatpush1.msra.mxu1 %v240_v3  ;;  %v346_v12 = vld [vmem:[%s862_s2] sm:$0xff]  ;;  %v235_v14 = vld [vmem:[%s222_s28 + $0x18] sm:$0xff]  ;;  %v347_v17 = vld [vmem:[%s862_s2 + $0x8] sm:$0xff]  ;;  %s583_s28 = sshll.u32 %s215_s27, 5 }
  0x16   : > { %285 = vmatprep.subr.mxu0 %v239_v4  ;;  %606 = vmatprep.subr.mxu1 %v239_v4  ;;  %v349_v16 = vld [vmem:[%s862_s2 + $0x18] sm:$0xff]  ;;  %v379_v18 = vld [vmem:[%s863_s3 + $0x8] sm:$0xff]  ;;  %v378_v19 = vld [vmem:[%s863_s3] sm:$0xff]  ;;  %s217_s29 = scalar_lea.vmem [#allocation2], %s583_s28 }
  0x17   : > { %286 = vmatpush1.msra.mxu0 %v238_v5  ;;  %610 = vmatpush1.msra.mxu1 %v238_v5  ;;  %v381_v20 = vld [vmem:[%s863_s3 + $0x18] sm:$0xff]  ;;  %v380_v21 = vld [vmem:[%s863_s3 + $0x10] sm:$0xff] }
  0x18   : > { %287 = vmatprep.subr.mxu0 %v237_v6  ;;  %607 = vmatprep.subr.mxu1 %v237_v6 }
  0x19   : > { %288 = vmatpush1.msra.mxu0 %v236_v7  ;;  %611 = vmatpush1.msra.mxu1 %v236_v7 }
  0x1a   : > { %321 = vmatprep.mubr.f32.mxu0 %v712_v10  ;;  %333 = vmatprep.mubr.f32.mxu1 %v712_v10 }
  0x1b   : > { %586 = vmatmul.mubr.msk.f32.vlgmr.msra.gmra.mxu0 %vm244_vm0, %v232_v8  ;;  %588 = vmatmul.mubr.msk.f32.vlgmr.msra.gmra.mxu1 %vm244_vm0, %v234_v9 }
  0x1c   : > { %327 = vmatprep.mubr.f32.mxu0 %v712_v10  ;;  %339 = vmatprep.mubr.f32.mxu1 %v712_v10 }
  0x1d   : > { %655 = vset.pattern.permute.xlu1 %v713_v15  ;;  %654 = vset.pattern.permute.xlu0 %v713_v15 }
  0x1e   : > { %362 = vperm.xlu1 %655, %v348_v11   ;;  %352 = vperm.xlu0 %654, %v346_v12  }
  0x1f   : > { %587 = vmatmul.mubr.msk.f32.gmra.mxu0 %vm244_vm0, %v233_v13  ;;  %589 = vmatmul.mubr.msk.f32.gmra.mxu1 %vm244_vm0, %v235_v14 }
  0x22   : > { %367 = vperm.xlu1 %655, %v349_v16   ;;  %357 = vperm.xlu0 %654, %v347_v17  }
  0x26   : > { %389 = vperm.xlu1 %655, %v379_v18   ;;  %384 = vperm.xlu0 %654, %v378_v19  }
  0x2a   : > { %399 = vperm.xlu1 %655, %v381_v20   ;;  %394 = vperm.xlu0 %654, %v380_v21  }
  0x99   : > { %v353_v22 = vpop.permute.xlu0 %352  ;;  %v363_v23 = vpop.permute.xlu1 %362 }
  0x9d   : > { %v358_v24 = vpop.permute.xlu0 %357  ;;  %v368_v25 = vpop.permute.xlu1 %367 }
  0xa1   : > { %v385_v26 = vpop.permute.xlu0 %384  ;;  %v390_v29 = vpop.permute.xlu1 %389 }
  0xa5   : > { %v395_v30 = vpop.permute.xlu0 %394  ;;  %v400_v47 = vpop.permute.xlu1 %399 }
  0xdb   : > { %v323_v27 = vpop.f32.mrf.mxu0  ;;  %v335_v28 = vpop.f32.mrf.mxu1 }
  0xdc   : > { %v370_v31 = vmul.f32 %v353_v22, %v323_v27  ;;  %v374_v32 = vmul.f32 %v363_v23, %v335_v28 }
  0xdd   : > { %v325_v33 = vpop.f32.mrf.mxu0  ;;  %v337_v34 = vpop.f32.mrf.mxu1 }
  0xde   : > { %v402_v35 = vadd.f32 %v385_v26, %v370_v31  ;;  %v406_v36 = vadd.f32 %v395_v30, %v374_v32  ;;  %v371_v37 = vmul.f32 %v353_v22, %v325_v33  ;;  %v375_v38 = vmul.f32 %v363_v23, %v337_v34 }
  0xdf   : > { %v329_v39 = vpop.f32.mrf.mxu0  ;;  %v341_v40 = vpop.f32.mrf.mxu1 }
  0xe0   : > { %656 = vtanh.f32 %v402_v35  ;;  %v403_v41 = vadd.f32 %v385_v26, %v371_v37  ;;  %v407_v42 = vadd.f32 %v395_v30, %v375_v38  ;;  %v372_v43 = vmul.f32 %v358_v24, %v329_v39 }
  0xe1   : > { %658 = vtanh.f32 %v406_v36  ;;  %v376_v44 = vmul.f32 %v368_v25, %v341_v40  ;;  %v331_v45 = vpop.f32.mrf.mxu0  ;;  %v343_v46 = vpop.f32.mrf.mxu1 }
  0xe2   : > { %660 = vtanh.f32 %v403_v41  ;;  %v404_v48 = vadd.f32 %v390_v29, %v372_v43  ;;  %v373_v49 = vmul.f32 %v358_v24, %v331_v45  ;;  %v377_v50 = vmul.f32 %v368_v25, %v343_v46 }
  0xe3   : > { %662 = vtanh.f32 %v407_v42  ;;  %v408_v51 = vadd.f32 %v400_v47, %v376_v44 }
  0xe4   : > { %664 = vtanh.f32 %v404_v48  ;;  %v405_v52 = vadd.f32 %v390_v29, %v373_v49  ;;  %v409_v53 = vadd.f32 %v400_v47, %v377_v50 }
  0xe5   : > { %666 = vtanh.f32 %v408_v51 }
  0xe6   : > { %668 = vtanh.f32 %v405_v52 }
  0xe7   : > { %670 = vtanh.f32 %v409_v53 }
  0xed   : > { %v657_v54 = vpop.eup %656 }
  0xee   : > { %v659_v55 = vpop.eup %658 }
  0xef   : > { %v661_v56 = vpop.eup %660 }
  0xf0   : > { %v663_v57 = vpop.eup %662  ;;  %v599_v58 = vpack.c.bf16 %v661_v56, %v657_v54 }
  0xf1   : > { %v665_v59 = vpop.eup %664  ;;  %v601_v60 = vpack.c.bf16 %v663_v57, %v659_v55 }
  0xf2   : > { %v667_v61 = vpop.eup %666  ;;  %442 = vst [vmem:[%s217_s29] sm:$0xff] %v599_v58 }
  0xf3   : > { %v669_v62 = vpop.eup %668  ;;  %444 = vst [vmem:[%s217_s29 + $0x10] sm:$0xff] %v601_v60  ;;  %452 = sbr.rel (!%p771_p3) target bundleno = 256 (0x100), region = 40 }
  0xf4   : > { %v671_v63 = vpop.eup %670  ;;  %v600_v0 = vpack.c.bf16 %v669_v62, %v665_v59 }
  0xf5   : > { %v602_v1 = vpack.c.bf16 %v671_v63, %v667_v61 }
  0xf6   : > { %443 = vst [vmem:[%s217_s29 + $0x8] sm:$0xff] %v600_v0 }
  0xf7   : > { %445 = vst [vmem:[%s217_s29 + $0x18] sm:$0xff] %v602_v1 }
  0xf9   : > { %v491_v2 = vld [vmem:[%s217_s29] sm:$0xff] }
  0xfa   : > { %v495_v4 = vld [vmem:[%s217_s29 + $0x10] sm:$0xff]  ;;  %492 = vst [vmem:[%s456_s6] sm:$0xff] %v491_v2 }
  0xfb   : > { %496 = vst [vmem:[%s456_s6 + $0x20] sm:$0xff] %v495_v4 }
  0xfd   : > { %v493_v3 = vld [vmem:[%s217_s29 + $0x8] sm:$0xff] }
  0xfe   : > { %v497_v5 = vld [vmem:[%s217_s29 + $0x18] sm:$0xff]  ;;  %494 = vst [vmem:[%s456_s6 + $0x10] sm:$0xff] %v493_v3 }
  0xff   : > { %498 = vst [vmem:[%s456_s6 + $0x30] sm:$0xff] %v497_v5 }
 0x100 PF: > { %s14_s19 = sadd.s32 1, %s710_s19   ;;  %s866_s15 = smov %s698_s16 }
 0x101   : > { %p11_p9 = scmp.ge.s32.totalorder %s14_s19, 4   ;;  %s867_s16 = smov %s780_s25 }
 0x102   : > { %s868_s17 = smov %s706_s18  ;;  %s869_s18 = smov %s871_s21 }
 0x103   :  { %13 = sbr.rel (!%p11_p9) target bundleno = 3 (0x3), region = 107 }

// kernel: net3d_forward.18
= control target key start
LH: loop header
LB: loop body
LE: loop exit
PB: predicated region body
PF: predicated region fallthrough
CT: control target
= control target key end

     0   :  { %s918_s18 = smov 0   ;;  %s920_s19 = smov 0   ;;  %s1056_s0 = inlined_call_operand.vmem [shape: bf16[32,512], index: 0, kind: input, shape index: {}]   ;;  %s1057_s1 = inlined_call_operand.vmem [shape: bf16[32,32], index: 1, kind: input, shape index: {}]   ;;  %s1058_s2 = inlined_call_operand.vmem [shape: f32[32,1], index: 2, kind: input, shape index: {}]   ;;  %s1059_s3 = inlined_call_operand.vmem [shape: f32[64,32], index: 3, kind: input, shape index: {}]   ;;  %s1060_s4 = inlined_call_operand.vmem [shape: f32[32,256], index: 4, kind: input, shape index: {}]   ;;  %s1061_s5 = inlined_call_operand.vmem [shape: bf16[32,512], index: 5, kind: output, shape index: {}]  }
   0x1   :  { %s922_s20 = smov 0   ;;  %s924_s21 = smov 0  }
   0x2   :  { %s926_s22 = smov 0  }
   0x3 LB: > { %s27_s23 = sadd.s32 1, %s880_s21  ;;  %s754_s24 = sadd.s32 4294967295, %s884_s22   ;;  %s884_s22 = sphi %s926_s22, %s15_s22   ;;  %s880_s21 = sphi %s924_s21, %s1066_s21   ;;  %s876_s20 = sphi %s922_s20, %s1065_s20   ;;  %s872_s19 = sphi %s920_s19, %s1064_s19   ;;  %s868_s18 = sphi %s918_s18, %s1063_s18  }
   0x4   : > { %p29_p0 = scmp.ge.s32.totalorder %s27_s23, 2  ;;  %p43_p1 = scmp.ne.s32.totalorder %s872_s19, %s868_s18 }
   0x5   : > { %p44_p2 = scmp.eq.s32.totalorder %s884_s22, 0  ;;  %p169_p4 = scmp.eq.s32.totalorder %s754_s24, 1 }
   0x6   : > { %s1068_s23 = smov (%p29_p0, %s27_s23), 0  ;;  %s36_s26 = sadd.s32 1, %s872_s19 }
   0x7   : > { %p45_p3 = por %p44_p2, %p43_p1  ;;  %s33_s25 = ssub.s32 %s880_s21, %s1068_s23 }
   0x8   : > { %p34_p5 = scmp.eq.s32.totalorder %s33_s25, 0  ;;  %p953_p6 = por %p169_p4, %p43_p1 }
   0x9   : > { %p758_p7 = scmp.ge.s32.totalorder %s884_s22, 2 }
   0xa   : > { %s958_s28 = scalar_select %p34_p5, %s872_s19, %s36_s26  }
   0xb   : > { %206 = sbr.rel (%p758_p7) target bundleno = 22 (0x16), region = 28 }
  0x10   : > { %209 = sbr.rel (!%p45_p3) target bundleno = 22 (0x16), region = 32  ;;  %s211_s29 = sand.u32 (%p45_p3), 1, %s872_s19  }
  0x11   : > { %s788_s30 = sshll.u32 (%p45_p3), %s880_s21, 3  ;;  %s759_s6 = sshll.u32 (%p45_p3), %s211_s29, 5 }
  0x12   : > { %s217_s9 = scalar_lea.vmem (%p45_p3), %s1056_s0, %s788_s30  ;;  %s213_s10 = scalar_lea.vmem (%p45_p3), [#allocation2], %s759_s6 }
  0x13   : > { %v252_v0 = vld [vmem:[%s217_s9] sm:$0xff] (%p45_p3)  ;;  %v254_v1 = vld [vmem:[%s217_s9 + $0x10] sm:$0xff] (%p45_p3) }
  0x14   : > { %v256_v2 = vld [vmem:[%s217_s9 + $0x20] sm:$0xff] (%p45_p3)  ;;  %253 = vst [vmem:[%s213_s10] sm:$0xff] (%p45_p3), %v252_v0  ;;  %255 = vst [vmem:[%s213_s10 + $0x8] sm:$0xff] (%p45_p3), %v254_v1  ;;  %v258_v3 = vld [vmem:[%s217_s9 + $0x30] sm:$0xff] (%p45_p3) }
  0x15   : > { %257 = vst [vmem:[%s213_s10 + $0x10] sm:$0xff] %v256_v2  ;;  %259 = vst [vmem:[%s213_s10 + $0x18] sm:$0xff] %v258_v3 }
  0x16 PF: > { %p762_p8 = scmp.ge.s32.totalorder %s884_s22, 1  ;;  %p273_p9 = scmp.lt.s32.totalorder %s884_s22, 3 }
  0x18   : > { %p274_p10 = pnand %p762_p8, %p273_p9 }
  0x19   : > { %s280_s17 = sand.u32 (!%p274_p10), 1, %s868_s18   ;;  %s765_s24 = sshll.u32 (!%p274_p10), %s876_s20, 2 }
  0x1a   : > { %277 = sbr.rel (%p274_p10) target bundleno = 265 (0x109), region = 74  ;;  %s979_s25 = sshll.u32 (!%p274_p10), %s280_s17, 5 }
  0x1b   : > { %p319_p11 = scmp.lt.s32.totalorder (!%p274_p10), %s765_s24, 7  ;;  %s282_s10 = scalar_lea.vmem (!%p274_p10), [#allocation2], %s979_s25 }
  0x1c   : > { %s1025_s12 = scalar_lea.vmem (!%p274_p10), [#allocation3], %s979_s25 }
  0x1f   : > { %v352_v4 = vld [vmem:[%s1060_s4 + $0x38] sm:$0xff]  ;;  %v351_v5 = vld [vmem:[%s1060_s4 + $0x30] sm:$0xff]  ;;  %v350_v6 = vld [vmem:[%s1060_s4 + $0x28] sm:$0xff]  ;;  %v886_v8 = vmov 0.0   ;;  %s1070_s24 = smov (!%p319_p11, %s765_s24), 7  ;;  %v887_v13 = vmov 0  }
  0x20   : > { %390 = vmatprep.subr.mxu0 %v352_v4  ;;  %v349_v7 = vld [vmem:[%s1060_s4 + $0x20] sm:$0xff]  ;;  %430 = vmatprep.mubr.f32.mxu0 %v886_v8  ;;  %v348_v9 = vld [vmem:[%s1060_s4 + $0x18] sm:$0xff]  ;;  %v347_v10 = vld [vmem:[%s1060_s4 + $0x10] sm:$0xff]  ;;  %vm353_vm0 = vcmask 261120   ;;  %s766_s13 = sshll.u32 %s1070_s24, 3  ;;  %s793_s25 = sshll.u32 (%p953_p6), %s876_s20, 3 }
  0x21   : > { %391 = vmatpush1.msra.mxu0 %v351_v5  ;;  %v346_v11 = vld [vmem:[%s1060_s4 + $0x8] sm:$0xff]  ;;  %v838_v12 = vld [vmem:[%s282_s10 + $0x14] ss:$8 sps:$4 sm:$0xff]   ;;  %523 = vmatprep.mubr.bf16.mxu1 %v887_v13  ;;  %v840_v14 = vld [vmem:[%s282_s10 + $0x10] ss:$8 sps:$4 sm:$0xff]   ;;  %s322_s16 = scalar_lea.vmem %s1059_s3, %s766_s13  ;;  %s614_s15 = scalar_lea.vmem (%p953_p6), %s1061_s5, %s793_s25 }
  0x22   : > { %392 = vmatprep.subr.mxu0 %v350_v6  ;;  %836 = vset.pattern.permute.xlu0 %v887_v13  ;;  %v841_v15 = vld [vmem:[%s282_s10 + $0x4] ss:$8 sps:$4 sm:$0xff]   ;;  %v843_v17 = vld [vmem:[%s282_s10] ss:$8 sps:$4 sm:$0xff]   ;;  %v546_v21 = vld [vmem:[%s1058_s2 + $0x10] sm:$0xff] }
  0x23   : > { %393 = vmatpush1.msra.mxu0 %v349_v7  ;;  %503 = vmatprep.subr.bf16.mxu1 %v838_v12  ;;  %v345_v16 = vld [vmem:[%s1060_s4] sm:$0xff]  ;;  %v342_v22 = vld [vmem:[%s322_s16 + $0x8] sm:$0xff]  ;;  %v547_v24 = vld [vmem:[%s1058_s2 + $0x18] sm:$0xff] }
  0x24   : > { %394 = vmatprep.subr.mxu0 %v348_v9  ;;  %504 = vmatpush1.bf16.msra.mxu1 %v840_v14  ;;  %v341_v18 = vld [vmem:[%s322_s16] sm:$0xff]  ;;  %v545_v23 = vld [vmem:[%s1058_s2 + $0x8] sm:$0xff]  ;;  %v343_v25 = vld [vmem:[%s322_s16 + $0x10] sm:$0xff] }
  0x25   : > { %395 = vmatpush1.msra.mxu0 %v347_v10  ;;  %505 = vmatprep.subr.bf16.mxu1 %v841_v15  ;;  %v544_v19 = vld [vmem:[%s1058_s2] sm:$0xff]  ;;  %v845_v26 = vld [vmem:[%s1057_s1 + $0x8] sm:$0xff]   ;;  %v344_v27 = vld [vmem:[%s322_s16 + $0x18] sm:$0xff] }
  0x26   : > { %396 = vmatprep.subr.mxu0 %v346_v11  ;;  %837 = vset.pattern.permute.xlu1 %v887_v13  ;;  %v844_v20 = vld [vmem:[%s1057_s1] sm:$0xff]  }
  0x27   : > { %397 = vmatpush1.msra.mxu0 %v345_v16  ;;  %550 = vperm.xlu0 %836, %v544_v19  }
  0x28   : > { %767 = vmatmul.mubr.msk.f32.vlgmr.msra.gmra.mxu0 %vm353_vm0, %v341_v18  ;;  %506 = vmatpush1.bf16.msra.mxu1 %v843_v17 }
  0x29   : > { %436 = vmatprep.mubr.f32.mxu0 %v886_v8  ;;  %560 = vperm.xlu1 %837, %v546_v21  }
  0x2b   : > { %777 = vmatmul.mubr.msk.bf16.vlgmr.msra.gmra.mxu1 %vm353_vm0, %v844_v20  ;;  %555 = vperm.xlu0 %836, %v545_v23  }
  0x2c   : > { %768 = vmatmul.mubr.msk.f32.gmra.mxu0 %vm353_vm0, %v342_v22  ;;  %533 = vmatprep.mubr.bf16.mxu1 %v887_v13 }
  0x2d   : > { %442 = vmatprep.mubr.f32.mxu0 %v886_v8  ;;  %565 = vperm.xlu1 %837, %v547_v24  }
  0x30   : > { %769 = vmatmul.mubr.msk.f32.gmra.mxu0 %vm353_vm0, %v343_v25 }
  0x31   : > { %448 = vmatprep.mubr.f32.mxu0 %v886_v8 }
  0x33   : > { %778 = vmatmul.mubr.msk.bf16.gmra.mxu1 %vm353_vm0, %v845_v26 }
  0x34   : > { %770 = vmatmul.mubr.msk.f32.gmra.mxu0 %vm353_vm0, %v344_v27 }
  0xa2   : > { %v551_v30 = vpop.permute.xlu0 %550 }
  0xa4   : > { %v561_v50 = vpop.permute.xlu1 %560 }
  0xa6   : > { %v556_v42 = vpop.permute.xlu0 %555 }
  0xa8   : > { %v566_v0 = vpop.permute.xlu1 %565 }
  0xe8   : > { %v432_v28 = vpop.f32.mrf.mxu0 }
  0xea   : > { %v434_v29 = vpop.f32.mrf.mxu0 }
  0xeb   : > { %v525_v31 = vpop.f32.mrf.mxu1 }
  0xec   : > { %v438_v32 = vpop.f32.mrf.mxu0  ;;  %v526_v33 = vadd.f32 %v525_v31, %v432_v28 }
  0xed   : > { %v527_v34 = vpop.f32.mrf.mxu1 }
  0xee   : > { %v440_v35 = vpop.f32.mrf.mxu0  ;;  %v528_v36 = vadd.f32 %v527_v34, %v434_v29  ;;  %v568_v39 = vadd.f32 %v551_v30, %v526_v33 }
  0xef   : > { %v529_v37 = vpop.f32.mrf.mxu1 }
  0xf0   : > { %v444_v38 = vpop.f32.mrf.mxu0  ;;  %v569_v40 = vadd.f32 %v551_v30, %v528_v36  ;;  %v530_v41 = vadd.f32 %v529_v37, %v438_v32 }
  0xf1   : > { %v531_v43 = vpop.f32.mrf.mxu1 }
  0xf2   : > { %v446_v44 = vpop.f32.mrf.mxu0  ;;  %v789_v45 = vpack.c.bf16 %v569_v40, %v568_v39  ;;  %v532_v46 = vadd.f32 %v531_v43, %v440_v35  ;;  %v570_v48 = vadd.f32 %v556_v42, %v530_v41 }
  0xf3   : > { %v535_v47 = vpop.f32.mrf.mxu1 }
  0xf4   : > { %600 = vst [vmem:[%s1025_s12] sm:$0xff] %v789_v45  ;;  %v571_v49 = vadd.f32 %v556_v42, %v532_v46  ;;  %v536_v51 = vadd.f32 %v535_v47, %v444_v38  ;;  %v450_v52 = vpop.f32.mrf.mxu0 }
  0xf5   : > { %v537_v53 = vpop.f32.mrf.mxu1 }
  0xf6   : > { %v790_v54 = vpack.c.bf16 %v571_v49, %v570_v48  ;;  %v538_v55 = vadd.f32 %v537_v53, %v446_v44  ;;  %v572_v57 = vadd.f32 %v561_v50, %v536_v51  ;;  %v452_v60 = vpop.f32.mrf.mxu0 }
  0xf7   : > { %v539_v56 = vpop.f32.mrf.mxu1 }
  0xf8   : > { %601 = vst [vmem:[%s1025_s12 + $0x8] sm:$0xff] %v790_v54  ;;  %v573_v58 = vadd.f32 %v561_v50, %v538_v55  ;;  %v540_v59 = vadd.f32 %v539_v56, %v450_v52 }
  0xf9   : > { %v541_v61 = vpop.f32.mrf.mxu1 }
  0xfa   : > { %v791_v62 = vpack.c.bf16 %v573_v58, %v572_v57  ;;  %v542_v63 = vadd.f32 %v541_v61, %v452_v60  ;;  %v574_v1 = vadd.f32 %v566_v0, %v540_v59 }
  0xfb   : > { %v649_v4 = vld [vmem:[%s1025_s12] sm:$0xff] (%p953_p6) }
  0xfc   : > { %602 = vst [vmem:[%s1025_s12 + $0x10] sm:$0xff] %v791_v62  ;;  %v575_v2 = vadd.f32 %v566_v0, %v542_v63  ;;  %610 = sbr.rel (!%p953_p6) target bundleno = 265 (0x109), region = 82  ;;  %650 = vst [vmem:[%s614_s15] sm:$0xff] (%p953_p6), %v649_v4 }
  0xfe   : > { %v792_v3 = vpack.c.bf16 %v575_v2, %v574_v1 }
  0xff   : > { %v651_v5 = vld [vmem:[%s1025_s12 + $0x8] sm:$0xff] (%p953_p6) }
 0x100   : > { %603 = vst [vmem:[%s1025_s12 + $0x18] sm:$0xff] %v792_v3  ;;  %652 = vst [vmem:[%s614_s15 + $0x10] sm:$0xff] (%p953_p6), %v651_v5 }
 0x103   : > { %v653_v6 = vld [vmem:[%s1025_s12 + $0x10] sm:$0xff] }
 0x104   : > { %654 = vst [vmem:[%s614_s15 + $0x20] sm:$0xff] %v653_v6 }
 0x107   : > { %v655_v7 = vld [vmem:[%s1025_s12 + $0x18] sm:$0xff] }
 0x108   : > { %656 = vst [vmem:[%s614_s15 + $0x30] sm:$0xff] %v655_v7 }
 0x109 PF: > { %s15_s22 = sadd.s32 1, %s884_s22   ;;  %s1063_s18 = smov %s872_s19 }
 0x10a   : > { %p12_p12 = scmp.ge.s32.totalorder %s15_s22, 4   ;;  %s1064_s19 = smov %s958_s28 }
 0x10b   : > { %s1065_s20 = smov %s880_s21  ;;  %s1066_s21 = smov %s1068_s23 }
 0x10c   :  { %14 = sbr.rel (!%p12_p12) target bundleno = 3 (0x3), region = 157 }

// kernel: net3d_forward.14
= control target key start
LH: loop header
LB: loop body
LE: loop exit
PB: predicated region body
PF: predicated region fallthrough
CT: control target
= control target key end

     0   :  { %s942_s18 = smov 0   ;;  %s944_s19 = smov 0   ;;  %s1070_s0 = inlined_call_operand.vmem [shape: bf16[32,512], index: 0, kind: input, shape index: {}]   ;;  %s1071_s1 = inlined_call_operand.vmem [shape: bf16[32,32], index: 1, kind: input, shape index: {}]   ;;  %s1072_s2 = inlined_call_operand.vmem [shape: f32[32,1], index: 2, kind: input, shape index: {}]   ;;  %s1073_s3 = inlined_call_operand.vmem [shape: f32[64,32], index: 3, kind: input, shape index: {}]   ;;  %s1074_s4 = inlined_call_operand.vmem [shape: f32[32,256], index: 4, kind: input, shape index: {}]   ;;  %s1075_s5 = inlined_call_operand.vmem [shape: bf16[32,512], index: 5, kind: output, shape index: {}]  }
   0x1   :  { %s946_s20 = smov 0   ;;  %s948_s21 = smov 0  }
   0x2   :  { %s950_s22 = smov 0  }
   0x3 LB: > { %s27_s23 = sadd.s32 1, %s904_s21  ;;  %s762_s24 = sadd.s32 4294967295, %s908_s22   ;;  %s908_s22 = sphi %s950_s22, %s15_s22   ;;  %s904_s21 = sphi %s948_s21, %s1080_s21   ;;  %s900_s20 = sphi %s946_s20, %s1079_s20   ;;  %s896_s19 = sphi %s944_s19, %s1078_s19   ;;  %s892_s18 = sphi %s942_s18, %s1077_s18  }
   0x4   : > { %p29_p0 = scmp.ge.s32.totalorder %s27_s23, 2  ;;  %p43_p1 = scmp.ne.s32.totalorder %s896_s19, %s892_s18 }
   0x5   : > { %p44_p2 = scmp.eq.s32.totalorder %s908_s22, 0  ;;  %p169_p4 = scmp.eq.s32.totalorder %s762_s24, 1 }
   0x6   : > { %s1082_s23 = smov (%p29_p0, %s27_s23), 0  ;;  %s36_s26 = sadd.s32 1, %s896_s19 }
   0x7   : > { %p45_p3 = por %p44_p2, %p43_p1  ;;  %s33_s25 = ssub.s32 %s904_s21, %s1082_s23 }
   0x8   : > { %p34_p5 = scmp.eq.s32.totalorder %s33_s25, 0  ;;  %p977_p6 = por %p169_p4, %p43_p1 }
   0x9   : > { %p766_p7 = scmp.ge.s32.totalorder %s908_s22, 2 }
   0xa   : > { %s982_s28 = scalar_select %p34_p5, %s896_s19, %s36_s26  }
   0xb   : > { %206 = sbr.rel (%p766_p7) target bundleno = 22 (0x16), region = 28 }
  0x10   : > { %209 = sbr.rel (!%p45_p3) target bundleno = 22 (0x16), region = 32  ;;  %s211_s29 = sand.u32 (%p45_p3), 1, %s896_s19  }
  0x11   : > { %s796_s30 = sshll.u32 (%p45_p3), %s904_s21, 3  ;;  %s767_s6 = sshll.u32 (%p45_p3), %s211_s29, 5 }
  0x12   : > { %s217_s9 = scalar_lea.vmem (%p45_p3), %s1070_s0, %s796_s30  ;;  %s213_s10 = scalar_lea.vmem (%p45_p3), [#allocation2], %s767_s6 }
  0x13   : > { %v252_v0 = vld [vmem:[%s217_s9] sm:$0xff] (%p45_p3)  ;;  %v254_v1 = vld [vmem:[%s217_s9 + $0x10] sm:$0xff] (%p45_p3) }
  0x14   : > { %v256_v2 = vld [vmem:[%s217_s9 + $0x20] sm:$0xff] (%p45_p3)  ;;  %253 = vst [vmem:[%s213_s10] sm:$0xff] (%p45_p3), %v252_v0  ;;  %255 = vst [vmem:[%s213_s10 + $0x8] sm:$0xff] (%p45_p3), %v254_v1  ;;  %v258_v3 = vld [vmem:[%s217_s9 + $0x30] sm:$0xff] (%p45_p3) }
  0x15   : > { %257 = vst [vmem:[%s213_s10 + $0x10] sm:$0xff] %v256_v2  ;;  %259 = vst [vmem:[%s213_s10 + $0x18] sm:$0xff] %v258_v3 }
  0x16 PF: > { %p770_p8 = scmp.ge.s32.totalorder %s908_s22, 1  ;;  %p273_p9 = scmp.lt.s32.totalorder %s908_s22, 3 }
  0x18   : > { %p274_p10 = pnand %p770_p8, %p273_p9 }
  0x19   : > { %s280_s17 = sand.u32 (!%p274_p10), 1, %s892_s18   ;;  %s773_s24 = sshll.u32 (!%p274_p10), %s900_s20, 2 }
  0x1a   : > { %277 = sbr.rel (%p274_p10) target bundleno = 279 (0x117), region = 74  ;;  %s1003_s25 = sshll.u32 (!%p274_p10), %s280_s17, 5 }
  0x1b   : > { %p319_p11 = scmp.lt.s32.totalorder (!%p274_p10), %s773_s24, 7  ;;  %s282_s10 = scalar_lea.vmem (!%p274_p10), [#allocation2], %s1003_s25 }
  0x1c   : > { %s315_s12 = scalar_lea.vmem (!%p274_p10), [#allocation3], %s1003_s25 }
  0x1f   : > { %v352_v4 = vld [vmem:[%s1074_s4 + $0x38] sm:$0xff]  ;;  %v351_v5 = vld [vmem:[%s1074_s4 + $0x30] sm:$0xff]  ;;  %v350_v6 = vld [vmem:[%s1074_s4 + $0x28] sm:$0xff]  ;;  %v910_v8 = vmov 0.0   ;;  %s1084_s24 = smov (!%p319_p11, %s773_s24), 7  ;;  %v911_v13 = vmov 0  }
  0x20   : > { %390 = vmatprep.subr.mxu0 %v352_v4  ;;  %v349_v7 = vld [vmem:[%s1074_s4 + $0x20] sm:$0xff]  ;;  %430 = vmatprep.mubr.f32.mxu0 %v910_v8  ;;  %v348_v9 = vld [vmem:[%s1074_s4 + $0x18] sm:$0xff]  ;;  %v347_v10 = vld [vmem:[%s1074_s4 + $0x10] sm:$0xff]  ;;  %vm353_vm0 = vcmask 261120   ;;  %s774_s13 = sshll.u32 %s1084_s24, 3 }
  0x21   : > { %391 = vmatpush1.msra.mxu0 %v351_v5  ;;  %v346_v11 = vld [vmem:[%s1074_s4 + $0x8] sm:$0xff]  ;;  %v846_v12 = vld [vmem:[%s282_s10 + $0x14] ss:$8 sps:$4 sm:$0xff]   ;;  %523 = vmatprep.mubr.bf16.mxu1 %v911_v13  ;;  %v848_v14 = vld [vmem:[%s282_s10 + $0x10] ss:$8 sps:$4 sm:$0xff]   ;;  %s322_s16 = scalar_lea.vmem %s1073_s3, %s774_s13  ;;  %s801_s13 = sshll.u32 (%p977_p6), %s900_s20, 3 }
  0x22   : > { %392 = vmatprep.subr.mxu0 %v350_v6  ;;  %844 = vset.pattern.permute.xlu0 %v911_v13  ;;  %v849_v15 = vld [vmem:[%s282_s10 + $0x4] ss:$8 sps:$4 sm:$0xff]   ;;  %v851_v17 = vld [vmem:[%s282_s10] ss:$8 sps:$4 sm:$0xff]   ;;  %v546_v21 = vld [vmem:[%s1072_s2 + $0x10] sm:$0xff]  ;;  %s622_s15 = scalar_lea.vmem (%p977_p6), %s1075_s5, %s801_s13 }
  0x23   : > { %393 = vmatpush1.msra.mxu0 %v349_v7  ;;  %503 = vmatprep.subr.bf16.mxu1 %v846_v12  ;;  %v345_v16 = vld [vmem:[%s1074_s4] sm:$0xff]  ;;  %v342_v22 = vld [vmem:[%s322_s16 + $0x8] sm:$0xff]  ;;  %v547_v24 = vld [vmem:[%s1072_s2 + $0x18] sm:$0xff] }
  0x24   : > { %394 = vmatprep.subr.mxu0 %v348_v9  ;;  %504 = vmatpush1.bf16.msra.mxu1 %v848_v14  ;;  %v341_v18 = vld [vmem:[%s322_s16] sm:$0xff]  ;;  %v545_v23 = vld [vmem:[%s1072_s2 + $0x8] sm:$0xff]  ;;  %v343_v25 = vld [vmem:[%s322_s16 + $0x10] sm:$0xff] }
  0x25   : > { %395 = vmatpush1.msra.mxu0 %v347_v10  ;;  %505 = vmatprep.subr.bf16.mxu1 %v849_v15  ;;  %v544_v19 = vld [vmem:[%s1072_s2] sm:$0xff]  ;;  %v853_v26 = vld [vmem:[%s1071_s1 + $0x8] sm:$0xff]   ;;  %v344_v27 = vld [vmem:[%s322_s16 + $0x18] sm:$0xff] }
  0x26   : > { %396 = vmatprep.subr.mxu0 %v346_v11  ;;  %845 = vset.pattern.permute.xlu1 %v911_v13  ;;  %v852_v20 = vld [vmem:[%s1071_s1] sm:$0xff]  }
  0x27   : > { %397 = vmatpush1.msra.mxu0 %v345_v16  ;;  %550 = vperm.xlu0 %844, %v544_v19  }
  0x28   : > { %775 = vmatmul.mubr.msk.f32.vlgmr.msra.gmra.mxu0 %vm353_vm0, %v341_v18  ;;  %506 = vmatpush1.bf16.msra.mxu1 %v851_v17 }
  0x29   : > { %436 = vmatprep.mubr.f32.mxu0 %v910_v8  ;;  %560 = vperm.xlu1 %845, %v546_v21  }
  0x2b   : > { %785 = vmatmul.mubr.msk.bf16.vlgmr.msra.gmra.mxu1 %vm353_vm0, %v852_v20  ;;  %555 = vperm.xlu0 %844, %v545_v23  }
  0x2c   : > { %776 = vmatmul.mubr.msk.f32.gmra.mxu0 %vm353_vm0, %v342_v22  ;;  %533 = vmatprep.mubr.bf16.mxu1 %v911_v13 }
  0x2d   : > { %442 = vmatprep.mubr.f32.mxu0 %v910_v8  ;;  %565 = vperm.xlu1 %845, %v547_v24  }
  0x30   : > { %777 = vmatmul.mubr.msk.f32.gmra.mxu0 %vm353_vm0, %v343_v25 }
  0x31   : > { %448 = vmatprep.mubr.f32.mxu0 %v910_v8 }
  0x33   : > { %786 = vmatmul.mubr.msk.bf16.gmra.mxu1 %vm353_vm0, %v853_v26 }
  0x34   : > { %778 = vmatmul.mubr.msk.f32.gmra.mxu0 %vm353_vm0, %v344_v27 }
  0xa2   : > { %v551_v29 = vpop.permute.xlu0 %550 }
  0xa4   : > { %v561_v47 = vpop.permute.xlu1 %560 }
  0xa6   : > { %v556_v38 = vpop.permute.xlu0 %555 }
  0xa8   : > { %v566_v57 = vpop.permute.xlu1 %565 }
  0xe8   : > { %v432_v28 = vpop.f32.mrf.mxu0 }
  0xea   : > { %v434_v30 = vpop.f32.mrf.mxu0 }
  0xeb   : > { %v525_v31 = vpop.f32.mrf.mxu1 }
  0xec   : > { %v438_v32 = vpop.f32.mrf.mxu0  ;;  %v526_v33 = vadd.f32 %v525_v31, %v432_v28 }
  0xed   : > { %v527_v34 = vpop.f32.mrf.mxu1 }
  0xee   : > { %v440_v35 = vpop.f32.mrf.mxu0  ;;  %v568_v36 = vadd.f32 %v551_v29, %v526_v33  ;;  %v528_v37 = vadd.f32 %v527_v34, %v434_v30 }
  0xef   : > { %v529_v39 = vpop.f32.mrf.mxu1 }
  0xf0   : > { %v444_v40 = vpop.f32.mrf.mxu0  ;;  %v569_v41 = vadd.f32 %v551_v29, %v528_v37  ;;  %v530_v42 = vadd.f32 %v529_v39, %v438_v32  ;;  %854 = vtanh.f32 %v568_v36 }
  0xf1   : > { %v531_v43 = vpop.f32.mrf.mxu1 }
  0xf2   : > { %v446_v44 = vpop.f32.mrf.mxu0  ;;  %856 = vtanh.f32 %v569_v41  ;;  %v570_v45 = vadd.f32 %v556_v38, %v530_v42  ;;  %v532_v46 = vadd.f32 %v531_v43, %v440_v35 }
  0xf3   : > { %v535_v48 = vpop.f32.mrf.mxu1 }
  0xf4   : > { %v571_v49 = vadd.f32 %v556_v38, %v532_v46  ;;  %v536_v50 = vadd.f32 %v535_v48, %v444_v40  ;;  %858 = vtanh.f32 %v570_v45  ;;  %v450_v51 = vpop.f32.mrf.mxu0 }
  0xf5   : > { %v537_v52 = vpop.f32.mrf.mxu1 }
  0xf6   : > { %860 = vtanh.f32 %v571_v49  ;;  %v572_v53 = vadd.f32 %v561_v47, %v536_v50  ;;  %v538_v54 = vadd.f32 %v537_v52, %v446_v44  ;;  %v452_v59 = vpop.f32.mrf.mxu0 }
  0xf7   : > { %v539_v55 = vpop.f32.mrf.mxu1 }
  0xf8   : > { %v573_v56 = vadd.f32 %v561_v47, %v538_v54  ;;  %v540_v58 = vadd.f32 %v539_v55, %v450_v51  ;;  %862 = vtanh.f32 %v572_v53 }
  0xf9   : > { %v541_v60 = vpop.f32.mrf.mxu1 }
  0xfa   : > { %864 = vtanh.f32 %v573_v56  ;;  %v574_v61 = vadd.f32 %v566_v57, %v540_v58  ;;  %v542_v62 = vadd.f32 %v541_v60, %v452_v59 }
  0xfc   : > { %v575_v63 = vadd.f32 %v566_v57, %v542_v62  ;;  %866 = vtanh.f32 %v574_v61 }
  0xfd   : > { %v855_v0 = vpop.eup %854 }
  0xfe   : > { %868 = vtanh.f32 %v575_v63 }
  0xff   : > { %v857_v1 = vpop.eup %856 }
 0x100   : > { %v797_v2 = vpack.c.bf16 %v857_v1, %v855_v0 }
 0x101   : > { %v859_v3 = vpop.eup %858 }
 0x102   : > { %608 = vst [vmem:[%s315_s12] sm:$0xff] %v797_v2 }
 0x103   : > { %v861_v4 = vpop.eup %860 }
 0x104   : > { %v798_v5 = vpack.c.bf16 %v861_v4, %v859_v3 }
 0x105   : > { %v863_v6 = vpop.eup %862 }
 0x106   : > { %609 = vst [vmem:[%s315_s12 + $0x8] sm:$0xff] %v798_v5 }
 0x107   : > { %v865_v7 = vpop.eup %864 }
 0x108   : > { %v799_v8 = vpack.c.bf16 %v865_v7, %v863_v6 }
 0x109   : > { %v867_v9 = vpop.eup %866  ;;  %v657_v12 = vld [vmem:[%s315_s12] sm:$0xff] (%p977_p6) }
 0x10a   : > { %610 = vst [vmem:[%s315_s12 + $0x10] sm:$0xff] %v799_v8  ;;  %618 = sbr.rel (!%p977_p6) target bundleno = 279 (0x117), region = 82  ;;  %658 = vst [vmem:[%s622_s15] sm:$0xff] (%p977_p6), %v657_v12 }
 0x10b   : > { %v869_v10 = vpop.eup %868 }
 0x10c   : > { %v800_v11 = vpack.c.bf16 %v869_v10, %v867_v9 }
 0x10d   : > { %v659_v13 = vld [vmem:[%s315_s12 + $0x8] sm:$0xff] (%p977_p6) }
 0x10e   : > { %611 = vst [vmem:[%s315_s12 + $0x18] sm:$0xff] %v800_v11  ;;  %660 = vst [vmem:[%s622_s15 + $0x10] sm:$0xff] (%p977_p6), %v659_v13 }
 0x111   : > { %v661_v14 = vld [vmem:[%s315_s12 + $0x10] sm:$0xff] }
 0x112   : > { %662 = vst [vmem:[%s622_s15 + $0x20] sm:$0xff] %v661_v14 }
 0x115   : > { %v663_v15 = vld [vmem:[%s315_s12 + $0x18] sm:$0xff] }
 0x116   : > { %664 = vst [vmem:[%s622_s15 + $0x30] sm:$0xff] %v663_v15 }
 0x117 PF: > { %s15_s22 = sadd.s32 1, %s908_s22   ;;  %s1077_s18 = smov %s896_s19 }
 0x118   : > { %p12_p12 = scmp.ge.s32.totalorder %s15_s22, 4   ;;  %s1078_s19 = smov %s982_s28 }
 0x119   : > { %s1079_s20 = smov %s904_s21  ;;  %s1080_s21 = smov %s1082_s23 }
 0x11a   :  { %14 = sbr.rel (!%p12_p12) target bundleno = 3 (0x3), region = 157 }

// kernel: net3d_forward.19
= control target key start
LH: loop header
LB: loop body
LE: loop exit
PB: predicated region body
PF: predicated region fallthrough
CT: control target
= control target key end

     0   :  { %s1126_s0 = inlined_call_operand.vmem [shape: bf16[32,512], index: 0, kind: input, shape index: {}]   ;;  %s1127_s1 = inlined_call_operand.vmem [shape: bf16[128,32], index: 1, kind: input, shape index: {}]   ;;  %s1128_s2 = inlined_call_operand.vmem [shape: f32[128,1], index: 2, kind: input, shape index: {}]   ;;  %s1129_s3 = inlined_call_operand.vmem [shape: bf16[1,128], index: 3, kind: input, shape index: {}]   ;;  %s1130_s4 = inlined_call_operand.<no memory space> [shape: f32[1,1], index: 4, kind: input, shape index: {}]   ;;  %s1131_s5 = inlined_call_operand.vmem [shape: f32[1,512], index: 5, kind: output, shape index: {}]  }
   0x1   :  { %v10_v0 = vstv %s1130_s4 }
   0x2   :  { %11 = vst [vmem:[#allocation2] sm:$0x1] %v10_v0 }
   0x3   :  { %s905_s20 = smov 0   ;;  %s907_s21 = smov 0  }
   0x4   :  { %s909_s22 = smov 0  }
   0x5 LB: > { %s771_s4 = sadd.s32 4294967295, %s868_s22   ;;  %s922_s23 = sadd.s32 1, %s868_s22   ;;  %s868_s22 = sphi %s909_s22, %s1134_s22   ;;  %s864_s21 = sphi %s907_s21, %s1133_s21   ;;  %s860_s20 = sphi %s905_s20, %s1132_s20  }
   0x6   : > { %s21_s24 = ssub.s32 %s868_s22, %s922_s23  ;;  %s24_s25 = sadd.s32 1, %s864_s21 }
   0x7   : > { %p22_p0 = scmp.eq.s32.totalorder %s21_s24, 0  ;;  %p31_p1 = scmp.ne.s32.totalorder %s864_s21, %s860_s20 }
   0x8   : > { %p32_p2 = scmp.eq.s32.totalorder %s868_s22, 0  ;;  %p774_p4 = scmp.ge.s32.totalorder %s868_s22, 2 }
   0x9   : > { %s931_s26 = scalar_select %p22_p0, %s864_s21, %s24_s25  }
   0xa   : > { %p33_p3 = por %p32_p2, %p31_p1  ;;  %179 = sbr.rel (%p774_p4) target bundleno = 21 (0x15), region = 32 }
   0xf   : > { %182 = sbr.rel (!%p33_p3) target bundleno = 21 (0x15), region = 36  ;;  %s184_s27 = sand.u32 (%p33_p3), 1, %s864_s21  }
  0x10   : > { %s803_s28 = sshll.u32 (%p33_p3), %s868_s22, 3  ;;  %s775_s29 = sshll.u32 (%p33_p3), %s184_s27, 5 }
  0x11   : > { %s189_s7 = scalar_lea.vmem (%p33_p3), %s1126_s0, %s803_s28  ;;  %s186_s8 = scalar_lea.vmem (%p33_p3), [#allocation3], %s775_s29 }
  0x12   : > { %v224_v1 = vld [vmem:[%s189_s7] sm:$0xff] (%p33_p3)  ;;  %v226_v2 = vld [vmem:[%s189_s7 + $0x10] sm:$0xff] (%p33_p3) }
  0x13   : > { %v228_v3 = vld [vmem:[%s189_s7 + $0x20] sm:$0xff] (%p33_p3)  ;;  %225 = vst [vmem:[%s186_s8] sm:$0xff] (%p33_p3), %v224_v1  ;;  %227 = vst [vmem:[%s186_s8 + $0x8] sm:$0xff] (%p33_p3), %v226_v2  ;;  %v230_v4 = vld [vmem:[%s189_s7 + $0x30] sm:$0xff] (%p33_p3) }
  0x14   : > { %229 = vst [vmem:[%s186_s8 + $0x10] sm:$0xff] %v228_v3  ;;  %231 = vst [vmem:[%s186_s8 + $0x18] sm:$0xff] %v230_v4 }
  0x15 PF: > { %p778_p5 = scmp.ge.s32.totalorder %s868_s22, 1  ;;  %p236_p6 = scmp.lt.s32.totalorder %s868_s22, 3 }
  0x17   : > { %p237_p7 = pnand %p778_p5, %p236_p6 }
  0x18   : > { %s243_s9 = sand.u32 (!%p237_p7), 1, %s860_s20   ;;  %s780_s20 = sshll.u32 (!%p237_p7), %s771_s4, 1 }
  0x19   : > { %240 = sbr.rel (%p237_p7) target bundleno = 540 (0x21c), region = 74  ;;  %s779_s10 = sshll.u32 (!%p237_p7), %s243_s9, 5 }
  0x1a   : > { %s245_s11 = scalar_lea.vmem (!%p237_p7), [#allocation3], %s779_s10  ;;  %p271_p8 = scmp.lt.s32.totalorder (!%p237_p7), %s780_s20, 3 }
  0x1e   : > { %v870_v5 = vmov 0   ;;  %v832_v6 = vld [vmem:[%s245_s11 + $0x14] ss:$8 sps:$4 sm:$0xff]   ;;  %v834_v7 = vld [vmem:[%s245_s11 + $0x10] ss:$8 sps:$4 sm:$0xff]   ;;  %vm452_vm0 = vcmask 261120  }
  0x1f   : > { %509 = vmatprep.mubr.bf16.mxu0 %v870_v5  ;;  %830 = vset.pattern.permute.xlu0 %v870_v5  ;;  %v835_v8 = vld [vmem:[%s245_s11 + $0x4] ss:$8 sps:$4 sm:$0xff]   ;;  %v837_v9 = vld [vmem:[%s245_s11] ss:$8 sps:$4 sm:$0xff]   ;;  %v311_v13 = vld [vmem:[%s1128_s2 + $0x78] sm:$0xff]  ;;  %s1136_s20 = smov (!%p271_p8, %s780_s20), 3 }
  0x20   : > { %831 = vset.pattern.permute.xlu1 %v870_v5  ;;  %681 = vmatprep.mubr.bf16.mxu1 %v870_v5  ;;  %v838_v10 = vld [vmem:[%s1127_s1] sm:$0xff]   ;;  %v310_v11 = vld [vmem:[%s1128_s2 + $0x70] sm:$0xff]  ;;  %v309_v14 = vld [vmem:[%s1128_s2 + $0x68] sm:$0xff]  ;;  %s273_s22 = scalar_lea.vmem %s1131_s5, %s1136_s20 }
  0x21   : > { %489 = vmatprep.subr.bf16.mxu0 %v832_v6  ;;  %v308_v12 = vld [vmem:[%s1128_s2 + $0x60] sm:$0xff]  ;;  %384 = vperm.xlu0 %830, %v310_v11   ;;  %v306_v15 = vld [vmem:[%s1128_s2 + $0x50] sm:$0xff]  ;;  %v307_v16 = vld [vmem:[%s1128_s2 + $0x58] sm:$0xff] }
  0x22   : > { %490 = vmatpush1.bf16.msra.mxu0 %v834_v7  ;;  %374 = vperm.xlu1 %831, %v308_v12   ;;  %v839_v17 = vld [vmem:[%s1127_s1 + $0x8] sm:$0xff]   ;;  %v304_v18 = vld [vmem:[%s1128_s2 + $0x40] sm:$0xff]  ;;  %v302_v20 = vld [vmem:[%s1128_s2 + $0x30] sm:$0xff] }
  0x23   : > { %491 = vmatprep.subr.bf16.mxu0 %v835_v8  ;;  %v305_v19 = vld [vmem:[%s1128_s2 + $0x48] sm:$0xff]  ;;  %v303_v21 = vld [vmem:[%s1128_s2 + $0x38] sm:$0xff]  ;;  %v840_v22 = vld [vmem:[%s1127_s1 + $0x10] sm:$0xff]  }
  0x24   : > { %v300_v23 = vld [vmem:[%s1128_s2 + $0x20] sm:$0xff]  ;;  %v301_v24 = vld [vmem:[%s1128_s2 + $0x28] sm:$0xff]  ;;  %v298_v25 = vld [vmem:[%s1128_s2 + $0x10] sm:$0xff] }
  0x25   : > { %389 = vperm.xlu0 %830, %v311_v13   ;;  %v299_v26 = vld [vmem:[%s1128_s2 + $0x18] sm:$0xff]  ;;  %v296_v28 = vld [vmem:[%s1128_s2] sm:$0xff]  ;;  %v297_v29 = vld [vmem:[%s1128_s2 + $0x8] sm:$0xff] }
  0x26   : > { %492 = vmatpush1.bf16.msra.mxu0 %v837_v9  ;;  %379 = vperm.xlu1 %831, %v309_v14   ;;  %v841_v27 = vld [vmem:[%s1127_s1 + $0x18] sm:$0xff]   ;;  %v639_v30 = vld [vmem:[#allocation2] sm:$0x1]  ;;  %v843_v32 = vld [vmem:[%s1127_s1 + $0x28] sm:$0xff]  }
  0x27   : > { %v842_v31 = vld [vmem:[%s1127_s1 + $0x20] sm:$0xff]   ;;  %v844_v33 = vld [vmem:[%s1127_s1 + $0x30] sm:$0xff]   ;;  %v845_v34 = vld [vmem:[%s1127_s1 + $0x38] sm:$0xff]  }
  0x29   : > { %793 = vmatmul.mubr.msk.bf16.vlgmr.msra.gmra.mxu0 %vm452_vm0, %v838_v10  ;;  %364 = vperm.xlu0 %830, %v306_v15  }
  0x2a   : > { %519 = vmatprep.mubr.bf16.mxu0 %v870_v5  ;;  %369 = vperm.xlu1 %831, %v307_v16  }
  0x2d   : > { %354 = vperm.xlu0 %830, %v304_v18  }
  0x2e   : > { %359 = vperm.xlu1 %831, %v305_v19  }
  0x31   : > { %794 = vmatmul.mubr.msk.bf16.gmra.mxu0 %vm452_vm0, %v839_v17  ;;  %344 = vperm.xlu0 %830, %v302_v20  }
  0x32   : > { %529 = vmatprep.mubr.bf16.mxu0 %v870_v5  ;;  %349 = vperm.xlu1 %831, %v303_v21  }
  0x35   : > { %334 = vperm.xlu0 %830, %v300_v23  }
  0x36   : > { %339 = vperm.xlu1 %831, %v301_v24  }
  0x39   : > { %795 = vmatmul.mubr.msk.bf16.gmra.mxu0 %vm452_vm0, %v840_v22  ;;  %324 = vperm.xlu0 %830, %v298_v25  }
  0x3a   : > { %539 = vmatprep.mubr.bf16.mxu0 %v870_v5  ;;  %329 = vperm.xlu1 %831, %v299_v26  }
  0x3d   : > { %314 = vperm.xlu0 %830, %v296_v28  }
  0x3e   : > { %319 = vperm.xlu1 %831, %v297_v29  }
  0x41   : > { %796 = vmatmul.mubr.msk.bf16.gmra.mxu0 %vm452_vm0, %v841_v27  ;;  %642 = vperm.xlu0 %830, %v639_v30  }
  0x42   : > { %549 = vmatprep.mubr.bf16.mxu0 %v870_v5 }
  0x49   : > { %797 = vmatmul.mubr.msk.bf16.gmra.mxu0 %vm452_vm0, %v842_v31 }
  0x4a   : > { %559 = vmatprep.mubr.bf16.mxu0 %v870_v5 }
  0x51   : > { %798 = vmatmul.mubr.msk.bf16.gmra.mxu0 %vm452_vm0, %v843_v32 }
  0x52   : > { %569 = vmatprep.mubr.bf16.mxu0 %v870_v5 }
  0x59   : > { %799 = vmatmul.mubr.msk.bf16.gmra.mxu0 %vm452_vm0, %v844_v33 }
  0x5a   : > { %579 = vmatprep.mubr.bf16.mxu0 %v870_v5 }
  0x61   : > { %800 = vmatmul.mubr.msk.bf16.gmra.mxu0 %vm452_vm0, %v845_v34 }
  0x9c   : > { %v1033_v35 = vpop.permute.xlu0 %384 }
  0x9d   : > { %v1035_v36 = vpop.permute.xlu1 %374 }
  0xa0   : > { %v1037_v37 = vpop.permute.xlu0 %389 }
  0xa1   : > { %v1039_v38 = vpop.permute.xlu1 %379 }
  0xa4   : > { %v1041_v39 = vpop.permute.xlu0 %364 }
  0xa5   : > { %v1043_v40 = vpop.permute.xlu1 %369 }
  0xa8   : > { %v1045_v41 = vpop.permute.xlu0 %354 }
  0xa9   : > { %v1047_v42 = vpop.permute.xlu1 %359 }
  0xac   : > { %v1049_v43 = vpop.permute.xlu0 %344 }
  0xad   : > { %v1051_v44 = vpop.permute.xlu1 %349 }
  0xb0   : > { %v1053_v45 = vpop.permute.xlu0 %334 }
  0xb1   : > { %v1055_v46 = vpop.permute.xlu1 %339 }
  0xb4   : > { %v325_v47 = vpop.permute.xlu0 %324 }
  0xb5   : > { %v330_v48 = vpop.permute.xlu1 %329 }
  0xb8   : > { %v315_v49 = vpop.permute.xlu0 %314 }
  0xb9   : > { %v320_v52 = vpop.permute.xlu1 %319 }
  0xe9   : > { %v511_v50 = vpop.f32.mrf.mxu0 }
  0xea   : > { %v512_v53 = vadd.f32 %v511_v50, %v315_v49 }
  0xeb   : > { %v513_v51 = vpop.f32.mrf.mxu0 }
  0xec   : > { %v514_v55 = vadd.f32 %v513_v51, %v315_v49  ;;  %v590_v58 = vmax.f32 %v512_v53, 0.0 }
  0xed   : > { %v515_v54 = vpop.f32.mrf.mxu0 }
  0xee   : > { %v516_v56 = vadd.f32 %v515_v54, %v320_v52  ;;  %v591_v62 = vmax.f32 %v514_v55, 0.0 }
  0xef   : > { %v517_v57 = vpop.f32.mrf.mxu0 }
  0xf0   : > { %v592_v59 = vmax.f32 %v516_v56, 0.0  ;;  %v518_v60 = vadd.f32 %v517_v57, %v320_v52 }
  0xf1   : > { %v521_v61 = vpop.f32.mrf.mxu0 }
  0xf2   : > { %v1057_v63 = vpack.c.bf16 %v592_v59, %v590_v58  ;;  %v593_v0 = vmax.f32 %v518_v60, 0.0  ;;  %v522_v3 = vadd.f32 %v521_v61, %v325_v47 }
  0xf3   : > { %v523_v1 = vpop.f32.mrf.mxu0 }
  0xf4   : > { %v1059_v2 = vpack.c.bf16 %v593_v0, %v591_v62  ;;  %v524_v5 = vadd.f32 %v523_v1, %v325_v47  ;;  %v594_v8 = vmax.f32 %v522_v3, 0.0 }
  0xf5   : > { %v525_v4 = vpop.f32.mrf.mxu0 }
  0xf6   : > { %v526_v6 = vadd.f32 %v525_v4, %v330_v48  ;;  %v595_v12 = vmax.f32 %v524_v5, 0.0 }
  0xf7   : > { %v527_v7 = vpop.f32.mrf.mxu0 }
  0xf8   : > { %v596_v9 = vmax.f32 %v526_v6, 0.0  ;;  %v528_v10 = vadd.f32 %v527_v7, %v330_v48 }
  0xf9   : > { %v1061_v11 = vpop.f32.mrf.mxu0 }
  0xfa   : > { %v1063_v13 = vpack.c.bf16 %v596_v9, %v594_v8  ;;  %v597_v14 = vmax.f32 %v528_v10, 0.0 }
  0xfb   : > { %v1065_v15 = vpop.f32.mrf.mxu0 }
  0xfc   : > { %v1067_v16 = vpack.c.bf16 %v597_v14, %v595_v12 }
  0xfd   : > { %v1069_v17 = vpop.f32.mrf.mxu0 }
  0xff   : > { %v1071_v18 = vpop.f32.mrf.mxu0 }
 0x101   : > { %v1073_v19 = vpop.f32.mrf.mxu0 }
 0x103   : > { %v543_v20 = vpop.f32.mrf.mxu0 }
 0x105   : > { %v545_v21 = vpop.f32.mrf.mxu0 }
 0x107   : > { %v547_v22 = vpop.f32.mrf.mxu0 }
 0x109   : > { %v551_v23 = vpop.f32.mrf.mxu0 }
 0x10b   : > { %v553_v24 = vpop.f32.mrf.mxu0 }
 0x10d   : > { %v555_v25 = vpop.f32.mrf.mxu0 }
 0x10e   : > { %v556_v14 = vadd.f32 %v555_v25, %v1047_v42 }
 0x10f   : > { %v557_v26 = vpop.f32.mrf.mxu0 }
 0x111   : > { %v561_v27 = vpop.f32.mrf.mxu0 }
 0x112   : > { %v562_v9 = vadd.f32 %v561_v27, %v1041_v39 }
 0x113   : > { %v563_v28 = vpop.f32.mrf.mxu0 }
 0x114   : > { %v564_v3 = vadd.f32 %v563_v28, %v1041_v39  ;;  %v544_v39 = vadd.f32 %v543_v20, %v1049_v43 }
 0x115   : > { %v565_v29 = vpop.f32.mrf.mxu0 }
 0x116   : > { %v566_v5 = vadd.f32 %v565_v29, %v1043_v40  ;;  %v611_v12 = vmax.f32 %v564_v3, 0.0  ;;  %v603_v20 = vmax.f32 %v544_v39, 0.0 }
 0x117   : > { %v567_v30 = vpop.f32.mrf.mxu0 }
 0x118   : > { %v568_v59 = vadd.f32 %v567_v30, %v1043_v40  ;;  %v612_v28 = vmax.f32 %v566_v5, 0.0  ;;  %v548_v40 = vadd.f32 %v547_v22, %v1051_v44  ;;  %v542_v22 = vadd.f32 %v1073_v19, %v1049_v43 }
 0x119   : > { %v571_v31 = vpop.f32.mrf.mxu0 }
 0x11a   : > { %v572_v0 = vadd.f32 %v571_v31, %v1035_v36  ;;  %v605_v25 = vmax.f32 %v548_v40, 0.0 }
 0x11b   : > { %v573_v32 = vpop.f32.mrf.mxu0 }
 0x11c   : > { %v574_v55 = vadd.f32 %v573_v32, %v1035_v36  ;;  %v614_v10 = vmax.f32 %v572_v0, 0.0  ;;  %v554_v36 = vadd.f32 %v553_v24, %v1045_v41  ;;  %v610_v32 = vmax.f32 %v562_v9, 0.0 }
 0x11d   : > { %v575_v33 = vpop.f32.mrf.mxu0  ;;  %v546_v24 = vadd.f32 %v545_v21, %v1051_v44  ;;  %v536_v44 = vadd.f32 %v1069_v17, %v1055_v46 }
 0x11e   : > { %v576_v57 = vadd.f32 %v575_v33, %v1039_v38  ;;  %v615_v4 = vmax.f32 %v574_v55, 0.0  ;;  %v607_v27 = vmax.f32 %v554_v36, 0.0  ;;  %v608_v33 = vmax.f32 %v556_v14, 0.0  ;;  %v643_v55 = vpop.permute.xlu0 %642 }
 0x11f   : > { %v577_v34 = vpop.f32.mrf.mxu0  ;;  %v604_v21 = vmax.f32 %v546_v24, 0.0  ;;  %v600_v19 = vmax.f32 %v536_v44, 0.0 }
 0x120   : > { %v578_v50 = vadd.f32 %v577_v34, %v1039_v38  ;;  %v616_v6 = vmax.f32 %v576_v57, 0.0  ;;  %v613_v38 = vmax.f32 %v568_v59, 0.0  ;;  %v632_v34 = vpack.c.bf16 %v612_v28, %v610_v32 }
 0x121   : > { %v581_v47 = vpop.f32.mrf.mxu0 }
 0x122   : > { %v582_v53 = vadd.f32 %v581_v47, %v1033_v35  ;;  %v617_v60 = vmax.f32 %v578_v50, 0.0  ;;  %v634_v30 = vpack.c.bf16 %v616_v6, %v614_v10  ;;  %v633_v31 = vpack.c.bf16 %v613_v38, %v611_v12 }
 0x123   : > { %v583_v48 = vpop.f32.mrf.mxu0  ;;  %v629_v50 = vpack.c.bf16 %v605_v25, %v603_v20 }
 0x124   : > { %v584_v51 = vadd.f32 %v583_v48, %v1033_v35  ;;  %v618_v1 = vmax.f32 %v582_v53, 0.0  ;;  %v635_v8 = vpack.c.bf16 %v617_v60, %v615_v4 }
 0x125   : > { %v585_v49 = vpop.f32.mrf.mxu0 }
 0x126   : > { %v586_v52 = vadd.f32 %v585_v49, %v1037_v37  ;;  %v619_v61 = vmax.f32 %v584_v51, 0.0  ;;  %v602_v51 = vmax.f32 %v542_v22, 0.0 }
 0x127   : > { %v587_v54 = vpop.f32.mrf.mxu0 }
 0x128   : > { %v588_v56 = vadd.f32 %v587_v54, %v1037_v37  ;;  %v620_v58 = vmax.f32 %v586_v52, 0.0  ;;  %v558_v37 = vadd.f32 %v557_v26, %v1047_v42  ;;  %v552_v26 = vadd.f32 %v551_v23, %v1045_v41 }
 0x129   : > { %v538_v42 = vadd.f32 %v1071_v18, %v1055_v46  ;;  %v534_v41 = vadd.f32 %v1065_v15, %v1053_v45  ;;  %v532_v18 = vadd.f32 %v1061_v11, %v1053_v45  ;;  %v628_v52 = vpack.c.bf16 %v604_v21, %v602_v51  ;;  %v638_v45 = vld [vmem:[%s1129_s3] sm:$0x1] }
 0x12a   : > { %v621_v62 = vmax.f32 %v588_v56, 0.0  ;;  %v636_v7 = vpack.c.bf16 %v620_v58, %v618_v1  ;;  %v609_v29 = vmax.f32 %v558_v37, 0.0  ;;  %v606_v48 = vmax.f32 %v552_v26, 0.0 }
 0x12b   : > { %v601_v49 = vmax.f32 %v538_v42, 0.0  ;;  %v599_v43 = vmax.f32 %v534_v41, 0.0  ;;  %v598_v15 = vmax.f32 %v532_v18, 0.0  ;;  %v645_v46 = vlaneseq }
 0x12c   : > { %v637_v35 = vpack.c.bf16 %v621_v62, %v619_v61  ;;  %v631_v47 = vpack.c.bf16 %v609_v29, %v607_v27  ;;  %v630_v23 = vpack.c.bf16 %v608_v33, %v606_v48  ;;  %v871_v56 = vmov 1966171168  }
 0x12d   : > { %v627_v53 = vpack.c.bf16 %v601_v49, %v599_v43  ;;  %v626_v54 = vpack.c.bf16 %v600_v19, %v598_v15  ;;  %v646_v11 = vshrl.u32 %v645_v46, 7  ;;  %v696_v57 = vunpack.c.l.s4 %v871_v56 }
 0x12e   : > { %649 = vmatprep.subr.bf16.mxu1 %v637_v35  ;;  %vm712_vm1 = vcmp.lt.s32.totalorder %v645_v46, 256 }
 0x12f   : > { %650 = vmatpush1.bf16.msra.mxu1 %v636_v7  ;;  %v647_v17 = vsub.s32 0, %v646_v11 }
 0x130   : > { %651 = vmatprep.subr.bf16.mxu1 %v635_v8 }
 0x131   : > { %v648_v58 = vrot.slane %v643_v55, %v647_v17 }
 0x133   : > { %652 = vmatpush1.bf16.msra.mxu1 %v634_v30 }
 0x134   : > { %653 = vmatprep.subr.bf16.mxu1 %v633_v31 }
 0x137   : > { %654 = vmatpush1.bf16.msra.mxu1 %v632_v34 }
 0x138   : > { %655 = vmatprep.subr.bf16.mxu1 %v631_v47 }
 0x13b   : > { %656 = vmatpush1.bf16.msra.mxu1 %v630_v23 }
 0x13c   : > { %657 = vmatprep.subr.bf16.mxu1 %v629_v50 }
 0x13f   : > { %658 = vmatpush1.bf16.msra.mxu1 %v628_v52 }
 0x140   : > { %659 = vmatprep.subr.bf16.mxu1 %v627_v53 }
 0x143   : > { %660 = vmatpush1.bf16.msra.mxu1 %v626_v54 }
 0x144   : > { %661 = vmatprep.subr.bf16.mxu1 %v1067_v16 }
 0x147   : > { %662 = vmatpush1.bf16.msra.mxu1 %v1063_v13  ;;  %v697_v13 = vunpack.c.0.s8 %v696_v57 }
 0x148   : > { %663 = vmatprep.subr.bf16.mxu1 %v1059_v2 }
 0x149   : > { %v700_v61 = vsub.s32 %v697_v13, %v646_v11 }
 0x14b   : > { %664 = vmatpush1.bf16.msra.mxu1 %v1057_v63 }
 0x14e   : > { %682 = vmatmul.mubr.bf16.vlgmr.msra.gmra.mxu1 %v638_v45 }
 0x20e   : > { %v683_v16 = vpop.f32.mrf.mxu1 }
 0x20f   : > { %v684_v59 = vadd.f32 %v683_v16, %v648_v58 }
 0x210   : > { %v685_v2 = vpop.f32.mrf.mxu1 }
 0x211   : > { %v686_v63 = vadd.f32 %v685_v2, %v648_v58  ;;  %v690_v62 = vmax.f32 %v684_v59, 0.0 }
 0x212   : > { %v687_v60 = vpop.f32.mrf.mxu1 }
 0x213   : > { %v691_v0 = vmax.f32 %v686_v63, 0.0 }
 0x214   : > { %v688_v1 = vpop.f32.mrf.mxu1 }
 0x215   : > { %v694_v3 = vcombine.low %v690_v62, %v691_v0 }
 0x217   : > { %v701_v4 = vrot.slane %v694_v3, %v700_v61 }
 0x219   : > { %v708_v35 = vrot.slane %v701_v4, %v700_v61 }
 0x21b   : > { %714 = vst.msk [vmem:[%s273_s22] sm:$0x3] %vm712_vm1, %v708_v35 }
 0x21c PF: > { %p14_p9 = scmp.ge.s32.totalorder %s922_s23, 4   ;;  %s1132_s20 = smov %s864_s21 }
 0x21d   : > { %s1133_s21 = smov %s931_s26  ;;  %s1134_s22 = smov %s922_s23 }
 0x21e   :  { %16 = sbr.rel (!%p14_p9) target bundleno = 5 (0x5), region = 113 }

</bundles_post_ra>
